<compile_context>
chip_gen: v7x
topology: tpu7x:2x2x1
jax: 0.10.0
libtpu: 0.0.40
codegen_flags: <defaults>
</compile_context>

<pallas_src>
import functools
import math

import jax
import jax.numpy as jnp
from jax.experimental import pallas as pl
from jax.experimental.pallas import tpu as pltpu


def _transformer_block_kernel(
    x_ref, cosq_ref, sinq_ref, cosk_ref, sink_ref, mask_ref,
    attn_nw_ref, ffn_nw_ref,
    wqkv_ref, wo_ref, w1_ref, w3_ref, w2_ref,
    out_ref,
    *, n_head, n_kv_head, head_dim, dim, eps, compute_dtype, approx_recip,
):
    """One batch element per grid step; the whole block is fused in VMEM."""
    x = x_ref[0]                                   # (S, D) f32
    S = x.shape[0]
    kv_size = n_kv_head * head_dim
    rep = n_head // n_kv_head
    cdt = compute_dtype

    def rmsnorm(v, w):                             # w: (1, D), f32 math
        ms = jnp.mean(v * v, axis=-1, keepdims=True)
        return v * jax.lax.rsqrt(ms + eps) * w

    def rope(t, cos_t, sin_t):
        # interleaved-pair rotation:
        #   out[2i]   = t[2i]*c_i - t[2i+1]*s_i
        #   out[2i+1] = t[2i]*s_i + t[2i+1]*c_i
        # cos_t / sin_t are pre-tiled to t's width (and pre-signed / pre-scaled).
        lane = jax.lax.broadcasted_iota(jnp.int32, t.shape, 1)
        swapped = jnp.where((lane % 2) == 0,
                            jnp.roll(t, -1, axis=-1),   # even lane -> right neighbour
                            jnp.roll(t, 1, axis=-1))    # odd lane  -> left neighbour
        return t * cos_t + swapped * sin_t

    # ---------------- attention ----------------
    xn = rmsnorm(x, attn_nw_ref[...]).astype(cdt)
    qkv = jnp.dot(xn, wqkv_ref[...], preferred_element_type=jnp.float32)
    q = qkv[:, :dim]
    k = qkv[:, dim:dim + kv_size]
    v = qkv[:, dim + kv_size:dim + 2 * kv_size].astype(cdt)

    # rope in f32 (softmax scale already folded into the q tables), cast for MXU
    q = rope(q, cosq_ref[...], sinq_ref[...]).astype(cdt)   # (S, dim)
    k = rope(k, cosk_ref[...], sink_ref[...]).astype(cdt)   # (S, kv_size)

    # causal already folded into the additive mask (wrapper); replicate once for
    # the rep query heads stacked along the M axis.
    mask = mask_ref[...]                                     # (S, S) f32
    mask_rep = mask if rep == 1 else jnp.concatenate([mask] * rep, axis=0)

    y_cols = []                                              # per-head (S, hd) slabs
    for g in range(n_kv_head):                               # loop over KV groups
        kg = k[:, g * head_dim:(g + 1) * head_dim]           # (S, hd)
        vg = v[:, g * head_dim:(g + 1) * head_dim]           # (S, hd)
        q_heads = [q[:, (g * rep + r) * head_dim:(g * rep + r + 1) * head_dim]
                   for r in range(rep)]
        qg = q_heads[0] if rep == 1 else jnp.concatenate(q_heads, axis=0)  # (rep*S, hd)

        s = jax.lax.dot_general(qg, kg, (((1,), (1,)), ((), ())),
                                preferred_element_type=jnp.float32)        # (rep*S, S)
        s = s + mask_rep
        s = s - jnp.max(s, axis=-1, keepdims=True)
        p = jnp.exp(s)
        denom = jnp.sum(p, axis=-1, keepdims=True)
        yg = jnp.dot(p.astype(cdt), vg, preferred_element_type=jnp.float32)  # (rep*S, hd)
        yg = yg * pl.reciprocal(denom, approx=approx_recip)  # normalize after P@V
        for r in range(rep):
            y_cols.append(yg[r * S:(r + 1) * S, :])          # head h = g*rep + r

    y = jnp.concatenate(y_cols, axis=-1).astype(cdt)         # (S, dim), head-major
    attn = jnp.dot(y, wo_ref[...], preferred_element_type=jnp.float32)  # one K=dim matmul

    h1 = x + attn

    # ---------------- feed-forward (SwiGLU) ----------------
    hn = rmsnorm(h1, ffn_nw_ref[...]).astype(cdt)
    a = jnp.dot(hn, w1_ref[...], preferred_element_type=jnp.float32)
    b = jnp.dot(hn, w3_ref[...], preferred_element_type=jnp.float32)
    f = (a * jax.nn.sigmoid(a) * b).astype(cdt)              # silu(a) * b, f32 math
    ffn = jnp.dot(f, w2_ref[...], preferred_element_type=jnp.float32)

    out_ref[0] = (h1 + ffn).astype(out_ref.dtype)


def transformer_block(x, freqs_cos, freqs_sin, mask, params,
                      *, n_head, n_kv_head, head_dim, eps=1e-5,
                      compute_dtype=jnp.bfloat16):
    B, S, D = x.shape
    kv_size = n_kv_head * head_dim
    total = (n_head + 2 * n_kv_head) * head_dim
    inter = params["w1"].shape[1]
    scale = 1.0 / math.sqrt(head_dim)
    cdt = compute_dtype
    approx_recip = jnp.dtype(cdt) == jnp.dtype(jnp.bfloat16)

    # Interleaved cos / signed-sin tables, pre-tiled to full q / kv widths
    # (hoisted broadcasts).  The softmax scale is folded into the q tables.
    cos_h = jnp.repeat(freqs_cos, 2, axis=-1)                            # (S, hd)
    sin_h = jnp.stack([-freqs_sin, freqs_sin], axis=-1).reshape(S, head_dim)
    cos_q = jnp.tile(cos_h, (1, n_head)) * scale                         # (S, D)
    sin_q = jnp.tile(sin_h, (1, n_head)) * scale                         # (S, D)
    cos_k = jnp.tile(cos_h, (1, n_kv_head))                              # (S, kv)
    sin_k = jnp.tile(sin_h, (1, n_kv_head))                              # (S, kv)

    # Fold the causal mask into the additive mask once (replace, don't add, to
    # avoid -inf/overflow concerns with user-supplied large-negative masks).
    causal = jnp.tril(jnp.ones((S, S), bool))
    mask_f = jnp.where(causal, mask.astype(jnp.float32), jnp.float32(-1e30))

    # Weights fed to the MXU in compute_dtype (bf16 halves resident VMEM).
    wqkv, wo, w1, w3, w2 = (params[n].astype(cdt)
                            for n in ("wqkv", "wo", "w1", "w3", "w2"))

    kernel = functools.partial(
        _transformer_block_kernel,
        n_head=n_head, n_kv_head=n_kv_head, head_dim=head_dim, dim=D, eps=eps,
        compute_dtype=cdt, approx_recip=approx_recip)

    def const_spec(shape):
        # Constant block index -> DMA'd once, resident across the whole grid.
        n = len(shape)
        return pl.BlockSpec(shape, lambda b, _n=n: (0,) * _n)

    return pl.pallas_call(
        kernel,
        out_shape=jax.ShapeDtypeStruct((B, S, D), x.dtype),
        grid=(B,),
        in_specs=[
            pl.BlockSpec((1, S, D), lambda b: (b, 0, 0)),   # x: one batch element / step
            const_spec((S, D)),                             # cos table for q (scaled)
            const_spec((S, D)),                             # sin table for q (scaled, signed)
            const_spec((S, kv_size)),                       # cos table for k
            const_spec((S, kv_size)),                       # sin table for k (signed)
            const_spec((S, S)),                             # additive mask (causal folded)
            const_spec((1, D)),                             # attention_norm.weight
            const_spec((1, D)),                             # ffn_norm.weight
            const_spec((D, total)),                         # wqkv
            const_spec((D, D)),                             # wo
            const_spec((D, inter)),                         # w1
            const_spec((D, inter)),                         # w3
            const_spec((inter, D)),                         # w2
        ],
        out_specs=pl.BlockSpec((1, S, D), lambda b: (b, 0, 0)),
        compiler_params=pltpu.CompilerParams(
            dimension_semantics=("parallel",),
            vmem_limit_bytes=32 * 1024 * 1024),
    )(x, cos_q, sin_q, cos_k, sin_k, mask_f,
      params["attn_norm"], params["ffn_norm"], wqkv, wo, w1, w3, w2)


def ref_transformer_block(x, freqs_cos, freqs_sin, mask, params,
                          *, n_head, n_kv_head, head_dim, eps=1e-5):
    """Pure-JAX f32 reference mirroring the PyTorch forward."""
    B, S, D = x.shape
    kv_size = n_kv_head * head_dim
    rep = n_head // n_kv_head

    def rms(v, w):
        return v * jax.lax.rsqrt(jnp.mean(v * v, -1, keepdims=True) + eps) * w

    xn = rms(x, params["attn_norm"][0])
    qkv = xn @ params["wqkv"]
    q = qkv[..., :D].reshape(B, S, n_head, head_dim)
    k = qkv[..., D:D + kv_size].reshape(B, S, n_kv_head, head_dim)
    v = qkv[..., D + kv_size:].reshape(B, S, n_kv_head, head_dim)

    def rope(t):
        tr = t.reshape(t.shape[:-1] + (head_dim // 2, 2))
        r, i = tr[..., 0], tr[..., 1]
        c = freqs_cos[None, :, None, :]
        s = freqs_sin[None, :, None, :]
        return jnp.stack([r * c - i * s, r * s + i * c], axis=-1).reshape(t.shape)

    q, k = rope(q), rope(k)
    q = q.transpose(0, 2, 1, 3)
    k = jnp.repeat(k.transpose(0, 2, 1, 3), rep, axis=1)
    v = jnp.repeat(v.transpose(0, 2, 1, 3), rep, axis=1)
    s = jnp.einsum("bhqd,bhkd->bhqk", q, k) / math.sqrt(head_dim)
    s = s + mask[None, None]
    causal = jnp.tril(jnp.ones((S, S), bool))
    s = jnp.where(causal[None, None], s, -jnp.inf)
    p = jax.nn.softmax(s, axis=-1)
    y = jnp.einsum("bhqk,bhkd->bhqd", p, v).transpose(0, 2, 1, 3).reshape(B, S, D)
    h = x + y @ params["wo"]

    hn = rms(h, params["ffn_norm"][0])
    ffn = (jax.nn.silu(hn @ params["w1"]) * (hn @ params["w3"])) @ params["w2"]
    return h + ffn


if __name__ == "__main__":
    # Small config consistent with ModelArgs(dim=128, n_head=4, n_local_heads=2,
    # intermediate_size=256) -> head_dim = 32.
    B, S = 2, 16
    dim, n_head, n_kv_head = 128, 4, 2
    head_dim = dim // n_head
    inter = 256
    eps = 1e-5
    rope_base = 10000.0

    key = jax.random.PRNGKey(0)
    ks = jax.random.split(key, 6)
    init = lambda k, shape: 0.02 * jax.random.normal(k, shape, jnp.float32)
    total_head_dim = (n_head + 2 * n_kv_head) * head_dim
    params = {
        "wqkv": init(ks[0], (dim, total_head_dim)),
        "wo":   init(ks[1], (dim, dim)),
        "w1":   init(ks[2], (dim, inter)),
        "w3":   init(ks[3], (dim, inter)),
        "w2":   init(ks[4], (inter, dim)),
        "attn_norm": jnp.ones((1, dim), jnp.float32),   # RMSNorm weights init to ones
        "ffn_norm":  jnp.ones((1, dim), jnp.float32),
    }
    x = jax.random.normal(ks[5], (B, S, dim), jnp.float32)

    inv_freq = 1.0 / (rope_base ** (jnp.arange(0, head_dim, 2, dtype=jnp.float32) / head_dim))
    t = jnp.arange(S, dtype=jnp.float32)
    ang = jnp.outer(t, inv_freq)                   # (S, head_dim // 2)
    freqs_cos, freqs_sin = jnp.cos(ang), jnp.sin(ang)

    # TODO(synk): F.scaled_dot_product_attention forbids attn_mask together with
    # is_causal=True; causal masking is applied in-kernel and `mask` is treated
    # as an extra additive mask (zeros here).
    mask = jnp.zeros((S, S), jnp.float32)

    ref = ref_transformer_block(x, freqs_cos, freqs_sin, mask, params,
                                n_head=n_head, n_kv_head=n_kv_head,
                                head_dim=head_dim, eps=eps)

    # f32 compute path: tight check against the f32 reference.
    out_f32 = jax.block_until_ready(
        transformer_block(x, freqs_cos, freqs_sin, mask, params,
                          n_head=n_head, n_kv_head=n_kv_head,
                          head_dim=head_dim, eps=eps,
                          compute_dtype=jnp.float32))
    assert jnp.allclose(out_f32, ref, atol=1e-4, rtol=1e-4), \
        float(jnp.max(jnp.abs(out_f32 - ref)))

    # bf16 MXU path (default): looser tolerance vs the f32 reference.
    out_bf16 = jax.block_until_ready(
        transformer_block(x, freqs_cos, freqs_sin, mask, params,
                          n_head=n_head, n_kv_head=n_kv_head,
                          head_dim=head_dim, eps=eps,
                          compute_dtype=jnp.bfloat16))
    assert jnp.allclose(out_bf16, ref, atol=1e-2, rtol=1e-2), \
        float(jnp.max(jnp.abs(out_bf16 - ref)))

    print("KERNEL_OK")
</pallas_src>

<mosaic_0001>
module attributes {stable_mosaic.version = 11 : i64} {
  func.func @_transformer_block_kernel(%arg0: i32, %arg1: memref<1x16x128xf32, #tpu.memory_space<vmem>>, %arg2: memref<16x128xf32, #tpu.memory_space<vmem>>, %arg3: memref<16x128xf32, #tpu.memory_space<vmem>>, %arg4: memref<16x64xf32, #tpu.memory_space<vmem>>, %arg5: memref<16x64xf32, #tpu.memory_space<vmem>>, %arg6: memref<16x16xf32, #tpu.memory_space<vmem>>, %arg7: memref<1x128xf32, #tpu.memory_space<vmem>>, %arg8: memref<1x128xf32, #tpu.memory_space<vmem>>, %arg9: memref<128x256xf32, #tpu.memory_space<vmem>>, %arg10: memref<128x128xf32, #tpu.memory_space<vmem>>, %arg11: memref<128x256xf32, #tpu.memory_space<vmem>>, %arg12: memref<128x256xf32, #tpu.memory_space<vmem>>, %arg13: memref<256x128xf32, #tpu.memory_space<vmem>>, %arg14: memref<1x16x128xf32, #tpu.memory_space<vmem>>) attributes {dimension_semantics = [#tpu.dimension_semantics<parallel>], iteration_bounds = array<i64: 2>, scalar_prefetch = 0 : i64, scratch_operands = 0 : i64, tpu.core_type = #tpu.core_type<tc>, window_params = [{transform_indices = @transform_0, window_bounds = array<i64: 1, 16, 128>}, {pipeline_mode = #tpu.pipeline_mode<synchronous>, transform_indices = @transform_1, window_bounds = array<i64: 16, 128>}, {pipeline_mode = #tpu.pipeline_mode<synchronous>, transform_indices = @transform_2, window_bounds = array<i64: 16, 128>}, {pipeline_mode = #tpu.pipeline_mode<synchronous>, transform_indices = @transform_3, window_bounds = array<i64: 16, 64>}, {pipeline_mode = #tpu.pipeline_mode<synchronous>, transform_indices = @transform_4, window_bounds = array<i64: 16, 64>}, {pipeline_mode = #tpu.pipeline_mode<synchronous>, transform_indices = @transform_5, window_bounds = array<i64: 16, 16>}, {pipeline_mode = #tpu.pipeline_mode<synchronous>, transform_indices = @transform_6, window_bounds = array<i64: 1, 128>}, {pipeline_mode = #tpu.pipeline_mode<synchronous>, transform_indices = @transform_7, window_bounds = array<i64: 1, 128>}, {pipeline_mode = #tpu.pipeline_mode<synchronous>, transform_indices = @transform_8, window_bounds = array<i64: 128, 256>}, {pipeline_mode = #tpu.pipeline_mode<synchronous>, transform_indices = @transform_9, window_bounds = array<i64: 128, 128>}, {pipeline_mode = #tpu.pipeline_mode<synchronous>, transform_indices = @transform_10, window_bounds = array<i64: 128, 256>}, {pipeline_mode = #tpu.pipeline_mode<synchronous>, transform_indices = @transform_11, window_bounds = array<i64: 128, 256>}, {pipeline_mode = #tpu.pipeline_mode<synchronous>, transform_indices = @transform_12, window_bounds = array<i64: 256, 128>}, {transform_indices = @transform_13, window_bounds = array<i64: 1, 16, 128>}]} {
    %c0 = arith.constant 0 : index
    %c0_0 = arith.constant 0 : index
    %c0_1 = arith.constant 0 : index
    %0 = vector.load %arg1[%c0, %c0_0, %c0_1] : memref<1x16x128xf32, #tpu.memory_space<vmem>>, vector<1x16x128xf32>
    %1 = vector.shape_cast %0 : vector<1x16x128xf32> to vector<16x128xf32>
    %c0_2 = arith.constant 0 : index
    %c0_3 = arith.constant 0 : index
    %2 = vector.load %arg7[%c0_2, %c0_3] : memref<1x128xf32, #tpu.memory_space<vmem>>, vector<1x128xf32>
    %3 = arith.mulf %1, %1 : vector<16x128xf32>
    %cst = arith.constant dense<0.000000e+00> : vector<16xf32>
    %4 = vector.multi_reduction <add>, %3, %cst [1] : vector<16x128xf32> to vector<16xf32>
    %5 = vector.shape_cast %4 : vector<16xf32> to vector<16x1xf32>
    %cst_4 = arith.constant 1.280000e+02 : f32
    %6 = vector.broadcast %cst_4 : f32 to vector<16x1xf32>
    %7 = arith.divf %5, %6 : vector<16x1xf32>
    %cst_5 = arith.constant 9.99999974E-6 : f32
    %8 = vector.broadcast %cst_5 : f32 to vector<16x1xf32>
    %9 = arith.addf %7, %8 : vector<16x1xf32>
    %10 = math.rsqrt %9 : vector<16x1xf32>
    %11 = vector.broadcast %10 : vector<16x1xf32> to vector<16x128xf32>
    %12 = arith.mulf %1, %11 : vector<16x128xf32>
    %13 = vector.broadcast %2 : vector<1x128xf32> to vector<16x128xf32>
    %14 = arith.mulf %12, %13 : vector<16x128xf32>
    %c0_6 = arith.constant 0 : index
    %c0_7 = arith.constant 0 : index
    %15 = vector.load %arg9[%c0_6, %c0_7] : memref<128x256xf32, #tpu.memory_space<vmem>>, vector<128x256xf32>
    %cst_8 = arith.constant dense<0.000000e+00> : vector<16x256xf32>
    %16 = tpu.matmul %14, %15, %cst_8 {dimension_numbers = #tpu.dot_dimension_numbers<[1], [0], [0], [1], [0, 0, 1, 1], [], []>} : vector<16x128xf32>, vector<128x256xf32>, vector<16x256xf32> -> vector<16x256xf32>
    %17 = vector.extract_strided_slice %16 {offsets = [0, 0], sizes = [16, 128], strides = [1, 1]} : vector<16x256xf32> to vector<16x128xf32>
    %18 = vector.extract_strided_slice %16 {offsets = [0, 128], sizes = [16, 64], strides = [1, 1]} : vector<16x256xf32> to vector<16x64xf32>
    %19 = vector.extract_strided_slice %16 {offsets = [0, 192], sizes = [16, 64], strides = [1, 1]} : vector<16x256xf32> to vector<16x64xf32>
    %c0_9 = arith.constant 0 : index
    %c0_10 = arith.constant 0 : index
    %20 = vector.load %arg2[%c0_9, %c0_10] : memref<16x128xf32, #tpu.memory_space<vmem>>, vector<16x128xf32>
    %c0_11 = arith.constant 0 : index
    %c0_12 = arith.constant 0 : index
    %21 = vector.load %arg3[%c0_11, %c0_12] : memref<16x128xf32, #tpu.memory_space<vmem>>, vector<16x128xf32>
    %22 = tpu.iota {dimensions = array<i32: 1>} : vector<16x128xi32>
    %c2_i32 = arith.constant 2 : i32
    %c0_i32 = arith.constant 0 : i32
    %23 = arith.cmpi eq, %c2_i32, %c0_i32 : i32
    %c1_i32 = arith.constant 1 : i32
    %24 = arith.select %23, %c1_i32, %c2_i32 : i32
    %25 = vector.broadcast %24 : i32 to vector<16x128xi32>
    %26 = arith.remsi %22, %25 : vector<16x128xi32>
    %c0_i32_13 = arith.constant 0 : i32
    %27 = vector.broadcast %c0_i32_13 : i32 to vector<16x128xi32>
    %28 = arith.cmpi ne, %26, %27 : vector<16x128xi32>
    %c0_i32_14 = arith.constant 0 : i32
    %29 = vector.broadcast %c0_i32_14 : i32 to vector<16x128xi32>
    %30 = arith.cmpi slt, %26, %29 : vector<16x128xi32>
    %c0_i32_15 = arith.constant 0 : i32
    %31 = arith.cmpi slt, %24, %c0_i32_15 : i32
    %32 = vector.broadcast %31 : i1 to vector<16x128xi1>
    %33 = vector.broadcast %32 : vector<16x128xi1> to vector<16x128xi1>
    %34 = arith.xori %30, %33 : vector<16x128xi1>
    %35 = arith.andi %34, %28 : vector<16x128xi1>
    %36 = vector.broadcast %24 : i32 to vector<16x128xi32>
    %37 = arith.addi %26, %36 : vector<16x128xi32>
    %38 = arith.select %35, %37, %26 : vector<16x128xi1>, vector<16x128xi32>
    %c0_i32_16 = arith.constant 0 : i32
    %39 = vector.broadcast %c0_i32_16 : i32 to vector<16x128xi32>
    %40 = arith.cmpi eq, %38, %39 : vector<16x128xi32>
    %41 = vector.extract_strided_slice %17 {offsets = [0, 1], sizes = [16, 127], strides = [1, 1]} : vector<16x128xf32> to vector<16x127xf32>
    %42 = vector.extract_strided_slice %17 {offsets = [0, 0], sizes = [16, 1], strides = [1, 1]} : vector<16x128xf32> to vector<16x1xf32>
    %43 = tpu.concatenate %41, %42 in 1 : vector<16x127xf32>, vector<16x1xf32> -> vector<16x128xf32>
    %44 = vector.extract_strided_slice %17 {offsets = [0, 127], sizes = [16, 1], strides = [1, 1]} : vector<16x128xf32> to vector<16x1xf32>
    %45 = vector.extract_strided_slice %17 {offsets = [0, 0], sizes = [16, 127], strides = [1, 1]} : vector<16x128xf32> to vector<16x127xf32>
    %46 = tpu.concatenate %44, %45 in 1 : vector<16x1xf32>, vector<16x127xf32> -> vector<16x128xf32>
    %47 = arith.select %40, %43, %46 : vector<16x128xi1>, vector<16x128xf32>
    %48 = arith.mulf %17, %20 : vector<16x128xf32>
    %49 = arith.mulf %47, %21 : vector<16x128xf32>
    %50 = arith.addf %48, %49 : vector<16x128xf32>
    %c0_17 = arith.constant 0 : index
    %c0_18 = arith.constant 0 : index
    %51 = vector.load %arg4[%c0_17, %c0_18] : memref<16x64xf32, #tpu.memory_space<vmem>>, vector<16x64xf32>
    %c0_19 = arith.constant 0 : index
    %c0_20 = arith.constant 0 : index
    %52 = vector.load %arg5[%c0_19, %c0_20] : memref<16x64xf32, #tpu.memory_space<vmem>>, vector<16x64xf32>
    %53 = tpu.iota {dimensions = array<i32: 1>} : vector<16x64xi32>
    %c2_i32_21 = arith.constant 2 : i32
    %c0_i32_22 = arith.constant 0 : i32
    %54 = arith.cmpi eq, %c2_i32_21, %c0_i32_22 : i32
    %c1_i32_23 = arith.constant 1 : i32
    %55 = arith.select %54, %c1_i32_23, %c2_i32_21 : i32
    %56 = vector.broadcast %55 : i32 to vector<16x64xi32>
    %57 = arith.remsi %53, %56 : vector<16x64xi32>
    %c0_i32_24 = arith.constant 0 : i32
    %58 = vector.broadcast %c0_i32_24 : i32 to vector<16x64xi32>
    %59 = arith.cmpi ne, %57, %58 : vector<16x64xi32>
    %c0_i32_25 = arith.constant 0 : i32
    %60 = vector.broadcast %c0_i32_25 : i32 to vector<16x64xi32>
    %61 = arith.cmpi slt, %57, %60 : vector<16x64xi32>
    %c0_i32_26 = arith.constant 0 : i32
    %62 = arith.cmpi slt, %55, %c0_i32_26 : i32
    %63 = vector.broadcast %62 : i1 to vector<16x64xi1>
    %64 = vector.broadcast %63 : vector<16x64xi1> to vector<16x64xi1>
    %65 = arith.xori %61, %64 : vector<16x64xi1>
    %66 = arith.andi %65, %59 : vector<16x64xi1>
    %67 = vector.broadcast %55 : i32 to vector<16x64xi32>
    %68 = arith.addi %57, %67 : vector<16x64xi32>
    %69 = arith.select %66, %68, %57 : vector<16x64xi1>, vector<16x64xi32>
    %c0_i32_27 = arith.constant 0 : i32
    %70 = vector.broadcast %c0_i32_27 : i32 to vector<16x64xi32>
    %71 = arith.cmpi eq, %69, %70 : vector<16x64xi32>
    %72 = vector.extract_strided_slice %18 {offsets = [0, 1], sizes = [16, 63], strides = [1, 1]} : vector<16x64xf32> to vector<16x63xf32>
    %73 = vector.extract_strided_slice %18 {offsets = [0, 0], sizes = [16, 1], strides = [1, 1]} : vector<16x64xf32> to vector<16x1xf32>
    %74 = tpu.concatenate %72, %73 in 1 : vector<16x63xf32>, vector<16x1xf32> -> vector<16x64xf32>
    %75 = vector.extract_strided_slice %18 {offsets = [0, 63], sizes = [16, 1], strides = [1, 1]} : vector<16x64xf32> to vector<16x1xf32>
    %76 = vector.extract_strided_slice %18 {offsets = [0, 0], sizes = [16, 63], strides = [1, 1]} : vector<16x64xf32> to vector<16x63xf32>
    %77 = tpu.concatenate %75, %76 in 1 : vector<16x1xf32>, vector<16x63xf32> -> vector<16x64xf32>
    %78 = arith.select %71, %74, %77 : vector<16x64xi1>, vector<16x64xf32>
    %79 = arith.mulf %18, %51 : vector<16x64xf32>
    %80 = arith.mulf %78, %52 : vector<16x64xf32>
    %81 = arith.addf %79, %80 : vector<16x64xf32>
    %c0_28 = arith.constant 0 : index
    %c0_29 = arith.constant 0 : index
    %82 = vector.load %arg6[%c0_28, %c0_29] : memref<16x16xf32, #tpu.memory_space<vmem>>, vector<16x16xf32>
    %83 = tpu.concatenate %82, %82 in 0 : vector<16x16xf32>, vector<16x16xf32> -> vector<32x16xf32>
    %84 = vector.extract_strided_slice %81 {offsets = [0, 0], sizes = [16, 32], strides = [1, 1]} : vector<16x64xf32> to vector<16x32xf32>
    %85 = vector.extract_strided_slice %19 {offsets = [0, 0], sizes = [16, 32], strides = [1, 1]} : vector<16x64xf32> to vector<16x32xf32>
    %86 = vector.extract_strided_slice %50 {offsets = [0, 0], sizes = [16, 32], strides = [1, 1]} : vector<16x128xf32> to vector<16x32xf32>
    %87 = vector.extract_strided_slice %50 {offsets = [0, 32], sizes = [16, 32], strides = [1, 1]} : vector<16x128xf32> to vector<16x32xf32>
    %88 = tpu.concatenate %86, %87 in 0 : vector<16x32xf32>, vector<16x32xf32> -> vector<32x32xf32>
    %cst_30 = arith.constant dense<0.000000e+00> : vector<32x16xf32>
    %89 = tpu.matmul %88, %84, %cst_30 {dimension_numbers = #tpu.dot_dimension_numbers<[1], [1], [0], [0], [0, 0, 1, 0], [], []>} : vector<32x32xf32>, vector<16x32xf32>, vector<32x16xf32> -> vector<32x16xf32>
    %90 = arith.addf %89, %83 : vector<32x16xf32>
    %cst_31 = arith.constant dense<0xFF800000> : vector<32xf32>
    %91 = vector.multi_reduction <maximumf>, %90, %cst_31 [1] : vector<32x16xf32> to vector<32xf32>
    %92 = vector.shape_cast %91 : vector<32xf32> to vector<32x1xf32>
    %93 = vector.broadcast %92 : vector<32x1xf32> to vector<32x16xf32>
    %94 = arith.subf %90, %93 : vector<32x16xf32>
    %95 = math.exp %94 : vector<32x16xf32>
    %cst_32 = arith.constant dense<0.000000e+00> : vector<32xf32>
    %96 = vector.multi_reduction <add>, %95, %cst_32 [1] : vector<32x16xf32> to vector<32xf32>
    %97 = vector.shape_cast %96 : vector<32xf32> to vector<32x1xf32>
    %cst_33 = arith.constant dense<0.000000e+00> : vector<32x32xf32>
    %98 = tpu.matmul %95, %85, %cst_33 {dimension_numbers = #tpu.dot_dimension_numbers<[1], [0], [0], [1], [0, 0, 1, 1], [], []>} : vector<32x16xf32>, vector<16x32xf32>, vector<32x32xf32> -> vector<32x32xf32>
    %99 = tpu.reciprocal %97 : vector<32x1xf32> -> vector<32x1xf32>
    %100 = vector.broadcast %99 : vector<32x1xf32> to vector<32x32xf32>
    %101 = arith.mulf %98, %100 : vector<32x32xf32>
    %102 = vector.extract_strided_slice %101 {offsets = [0, 0], sizes = [16, 32], strides = [1, 1]} : vector<32x32xf32> to vector<16x32xf32>
    %103 = vector.extract_strided_slice %101 {offsets = [16, 0], sizes = [16, 32], strides = [1, 1]} : vector<32x32xf32> to vector<16x32xf32>
    %104 = vector.extract_strided_slice %81 {offsets = [0, 32], sizes = [16, 32], strides = [1, 1]} : vector<16x64xf32> to vector<16x32xf32>
    %105 = vector.extract_strided_slice %19 {offsets = [0, 32], sizes = [16, 32], strides = [1, 1]} : vector<16x64xf32> to vector<16x32xf32>
    %106 = vector.extract_strided_slice %50 {offsets = [0, 64], sizes = [16, 32], strides = [1, 1]} : vector<16x128xf32> to vector<16x32xf32>
    %107 = vector.extract_strided_slice %50 {offsets = [0, 96], sizes = [16, 32], strides = [1, 1]} : vector<16x128xf32> to vector<16x32xf32>
    %108 = tpu.concatenate %106, %107 in 0 : vector<16x32xf32>, vector<16x32xf32> -> vector<32x32xf32>
    %cst_34 = arith.constant dense<0.000000e+00> : vector<32x16xf32>
    %109 = tpu.matmul %108, %104, %cst_34 {dimension_numbers = #tpu.dot_dimension_numbers<[1], [1], [0], [0], [0, 0, 1, 0], [], []>} : vector<32x32xf32>, vector<16x32xf32>, vector<32x16xf32> -> vector<32x16xf32>
    %110 = arith.addf %109, %83 : vector<32x16xf32>
    %cst_35 = arith.constant dense<0xFF800000> : vector<32xf32>
    %111 = vector.multi_reduction <maximumf>, %110, %cst_35 [1] : vector<32x16xf32> to vector<32xf32>
    %112 = vector.shape_cast %111 : vector<32xf32> to vector<32x1xf32>
    %113 = vector.broadcast %112 : vector<32x1xf32> to vector<32x16xf32>
    %114 = arith.subf %110, %113 : vector<32x16xf32>
    %115 = math.exp %114 : vector<32x16xf32>
    %cst_36 = arith.constant dense<0.000000e+00> : vector<32xf32>
    %116 = vector.multi_reduction <add>, %115, %cst_36 [1] : vector<32x16xf32> to vector<32xf32>
    %117 = vector.shape_cast %116 : vector<32xf32> to vector<32x1xf32>
    %cst_37 = arith.constant dense<0.000000e+00> : vector<32x32xf32>
    %118 = tpu.matmul %115, %105, %cst_37 {dimension_numbers = #tpu.dot_dimension_numbers<[1], [0], [0], [1], [0, 0, 1, 1], [], []>} : vector<32x16xf32>, vector<16x32xf32>, vector<32x32xf32> -> vector<32x32xf32>
    %119 = tpu.reciprocal %117 : vector<32x1xf32> -> vector<32x1xf32>
    %120 = vector.broadcast %119 : vector<32x1xf32> to vector<32x32xf32>
    %121 = arith.mulf %118, %120 : vector<32x32xf32>
    %122 = vector.extract_strided_slice %121 {offsets = [0, 0], sizes = [16, 32], strides = [1, 1]} : vector<32x32xf32> to vector<16x32xf32>
    %123 = vector.extract_strided_slice %121 {offsets = [16, 0], sizes = [16, 32], strides = [1, 1]} : vector<32x32xf32> to vector<16x32xf32>
    %124 = tpu.concatenate %102, %103, %122, %123 in 1 : vector<16x32xf32>, vector<16x32xf32>, vector<16x32xf32>, vector<16x32xf32> -> vector<16x128xf32>
    %c0_38 = arith.constant 0 : index
    %c0_39 = arith.constant 0 : index
    %125 = vector.load %arg10[%c0_38, %c0_39] : memref<128x128xf32, #tpu.memory_space<vmem>>, vector<128x128xf32>
    %cst_40 = arith.constant dense<0.000000e+00> : vector<16x128xf32>
    %126 = tpu.matmul %124, %125, %cst_40 {dimension_numbers = #tpu.dot_dimension_numbers<[1], [0], [0], [1], [0, 0, 1, 1], [], []>} : vector<16x128xf32>, vector<128x128xf32>, vector<16x128xf32> -> vector<16x128xf32>
    %127 = arith.addf %1, %126 : vector<16x128xf32>
    %c0_41 = arith.constant 0 : index
    %c0_42 = arith.constant 0 : index
    %128 = vector.load %arg8[%c0_41, %c0_42] : memref<1x128xf32, #tpu.memory_space<vmem>>, vector<1x128xf32>
    %129 = arith.mulf %127, %127 : vector<16x128xf32>
    %cst_43 = arith.constant dense<0.000000e+00> : vector<16xf32>
    %130 = vector.multi_reduction <add>, %129, %cst_43 [1] : vector<16x128xf32> to vector<16xf32>
    %131 = vector.shape_cast %130 : vector<16xf32> to vector<16x1xf32>
    %cst_44 = arith.constant 1.280000e+02 : f32
    %132 = vector.broadcast %cst_44 : f32 to vector<16x1xf32>
    %133 = arith.divf %131, %132 : vector<16x1xf32>
    %cst_45 = arith.constant 9.99999974E-6 : f32
    %134 = vector.broadcast %cst_45 : f32 to vector<16x1xf32>
    %135 = arith.addf %133, %134 : vector<16x1xf32>
    %136 = math.rsqrt %135 : vector<16x1xf32>
    %137 = vector.broadcast %136 : vector<16x1xf32> to vector<16x128xf32>
    %138 = arith.mulf %127, %137 : vector<16x128xf32>
    %139 = vector.broadcast %128 : vector<1x128xf32> to vector<16x128xf32>
    %140 = arith.mulf %138, %139 : vector<16x128xf32>
    %c0_46 = arith.constant 0 : index
    %c0_47 = arith.constant 0 : index
    %141 = vector.load %arg11[%c0_46, %c0_47] : memref<128x256xf32, #tpu.memory_space<vmem>>, vector<128x256xf32>
    %cst_48 = arith.constant dense<0.000000e+00> : vector<16x256xf32>
    %142 = tpu.matmul %140, %141, %cst_48 {dimension_numbers = #tpu.dot_dimension_numbers<[1], [0], [0], [1], [0, 0, 1, 1], [], []>} : vector<16x128xf32>, vector<128x256xf32>, vector<16x256xf32> -> vector<16x256xf32>
    %c0_49 = arith.constant 0 : index
    %c0_50 = arith.constant 0 : index
    %143 = vector.load %arg12[%c0_49, %c0_50] : memref<128x256xf32, #tpu.memory_space<vmem>>, vector<128x256xf32>
    %cst_51 = arith.constant dense<0.000000e+00> : vector<16x256xf32>
    %144 = tpu.matmul %140, %143, %cst_51 {dimension_numbers = #tpu.dot_dimension_numbers<[1], [0], [0], [1], [0, 0, 1, 1], [], []>} : vector<16x128xf32>, vector<128x256xf32>, vector<16x256xf32> -> vector<16x256xf32>
    %145 = arith.negf %142 : vector<16x256xf32>
    %146 = math.exp %145 : vector<16x256xf32>
    %cst_52 = arith.constant 1.000000e+00 : f32
    %147 = vector.broadcast %cst_52 : f32 to vector<16x256xf32>
    %148 = arith.addf %147, %146 : vector<16x256xf32>
    %149 = arith.divf %147, %148 : vector<16x256xf32>
    %150 = arith.mulf %142, %149 : vector<16x256xf32>
    %151 = arith.mulf %150, %144 : vector<16x256xf32>
    %c0_53 = arith.constant 0 : index
    %c0_54 = arith.constant 0 : index
    %152 = vector.load %arg13[%c0_53, %c0_54] : memref<256x128xf32, #tpu.memory_space<vmem>>, vector<256x128xf32>
    %cst_55 = arith.constant dense<0.000000e+00> : vector<16x128xf32>
    %153 = tpu.matmul %151, %152, %cst_55 {dimension_numbers = #tpu.dot_dimension_numbers<[1], [0], [0], [1], [0, 0, 1, 1], [], []>} : vector<16x256xf32>, vector<256x128xf32>, vector<16x128xf32> -> vector<16x128xf32>
    %154 = arith.addf %127, %153 : vector<16x128xf32>
    %c0_56 = arith.constant 0 : index
    %c0_57 = arith.constant 0 : index
    %c0_58 = arith.constant 0 : index
    %155 = vector.load %arg14[%c0_56, %c0_57, %c0_58] : memref<1x16x128xf32, #tpu.memory_space<vmem>>, vector<1x16x128xf32>
    %156 = vector.shape_cast %155 : vector<1x16x128xf32> to vector<16x128xf32>
    %157 = vector.shape_cast %154 : vector<16x128xf32> to vector<1x16x128xf32>
    tpu.vector_store %arg14[%c0_56, %c0_57, %c0_58], %157 {strides = array<i32>} : memref<1x16x128xf32, #tpu.memory_space<vmem>>, vector<1x16x128xf32>,
    return
  }
  func.func @transform_0(%arg0: i32) -> (i32, i32, i32) {
    %c0_i32 = arith.constant 0 : i32
    %c0_i32_0 = arith.constant 0 : i32
    %c0_i32_1 = arith.constant 0 : i32
    return %arg0, %c0_i32, %c0_i32_0 : i32, i32, i32
  }
  func.func @transform_1(%arg0: i32) -> (i32, i32) {
    %c0_i32 = arith.constant 0 : i32
    %c0_i32_0 = arith.constant 0 : i32
    %c0_i32_1 = arith.constant 0 : i32
    return %c0_i32, %c0_i32_0 : i32, i32
  }
  func.func @transform_2(%arg0: i32) -> (i32, i32) {
    %c0_i32 = arith.constant 0 : i32
    %c0_i32_0 = arith.constant 0 : i32
    %c0_i32_1 = arith.constant 0 : i32
    return %c0_i32, %c0_i32_0 : i32, i32
  }
  func.func @transform_3(%arg0: i32) -> (i32, i32) {
    %c0_i32 = arith.constant 0 : i32
    %c0_i32_0 = arith.constant 0 : i32
    %c0_i32_1 = arith.constant 0 : i32
    return %c0_i32, %c0_i32_0 : i32, i32
  }
  func.func @transform_4(%arg0: i32) -> (i32, i32) {
    %c0_i32 = arith.constant 0 : i32
    %c0_i32_0 = arith.constant 0 : i32
    %c0_i32_1 = arith.constant 0 : i32
    return %c0_i32, %c0_i32_0 : i32, i32
  }
  func.func @transform_5(%arg0: i32) -> (i32, i32) {
    %c0_i32 = arith.constant 0 : i32
    %c0_i32_0 = arith.constant 0 : i32
    %c0_i32_1 = arith.constant 0 : i32
    return %c0_i32, %c0_i32_0 : i32, i32
  }
  func.func @transform_6(%arg0: i32) -> (i32, i32) {
    %c0_i32 = arith.constant 0 : i32
    %c0_i32_0 = arith.constant 0 : i32
    %c0_i32_1 = arith.constant 0 : i32
    return %c0_i32, %c0_i32_0 : i32, i32
  }
  func.func @transform_7(%arg0: i32) -> (i32, i32) {
    %c0_i32 = arith.constant 0 : i32
    %c0_i32_0 = arith.constant 0 : i32
    %c0_i32_1 = arith.constant 0 : i32
    return %c0_i32, %c0_i32_0 : i32, i32
  }
  func.func @transform_8(%arg0: i32) -> (i32, i32) {
    %c0_i32 = arith.constant 0 : i32
    %c0_i32_0 = arith.constant 0 : i32
    %c0_i32_1 = arith.constant 0 : i32
    return %c0_i32, %c0_i32_0 : i32, i32
  }
  func.func @transform_9(%arg0: i32) -> (i32, i32) {
    %c0_i32 = arith.constant 0 : i32
    %c0_i32_0 = arith.constant 0 : i32
    %c0_i32_1 = arith.constant 0 : i32
    return %c0_i32, %c0_i32_0 : i32, i32
  }
  func.func @transform_10(%arg0: i32) -> (i32, i32) {
    %c0_i32 = arith.constant 0 : i32
    %c0_i32_0 = arith.constant 0 : i32
    %c0_i32_1 = arith.constant 0 : i32
    return %c0_i32, %c0_i32_0 : i32, i32
  }
  func.func @transform_11(%arg0: i32) -> (i32, i32) {
    %c0_i32 = arith.constant 0 : i32
    %c0_i32_0 = arith.constant 0 : i32
    %c0_i32_1 = arith.constant 0 : i32
    return %c0_i32, %c0_i32_0 : i32, i32
  }
  func.func @transform_12(%arg0: i32) -> (i32, i32) {
    %c0_i32 = arith.constant 0 : i32
    %c0_i32_0 = arith.constant 0 : i32
    %c0_i32_1 = arith.constant 0 : i32
    return %c0_i32, %c0_i32_0 : i32, i32
  }
  func.func @transform_13(%arg0: i32) -> (i32, i32, i32) {
    %c0_i32 = arith.constant 0 : i32
    %c0_i32_0 = arith.constant 0 : i32
    %c0_i32_1 = arith.constant 0 : i32
    return %arg0, %c0_i32, %c0_i32_0 : i32, i32, i32
  }
}

</mosaic_0001>

<bundles_post_ra>
// kernel: tpu_custom_call.1
= control target key start
LH: loop header
LB: loop body
LE: loop exit
PB: predicated region body
PF: predicated region fallthrough
CT: control target
= control target key end

     0   :  { %s3679_s0 = inlined_call_operand.hbm [shape: f32[2,16,128], index: 0, kind: input, shape index: {}]   ;;  %s3680_s1 = inlined_call_operand.hbm [shape: f32[16,128], index: 1, kind: input, shape index: {}]   ;;  %s3681_s2 = inlined_call_operand.hbm [shape: f32[16,128], index: 2, kind: input, shape index: {}]   ;;  %s3682_s3 = inlined_call_operand.hbm [shape: f32[16,64], index: 3, kind: input, shape index: {}]   ;;  %s3683_s4 = inlined_call_operand.hbm [shape: f32[16,64], index: 4, kind: input, shape index: {}]   ;;  %s3684_s5 = inlined_call_operand.vmem [shape: f32[16,16], index: 5, kind: input, shape index: {}]   ;;  %s3685_s6 = inlined_call_operand.vmem [shape: f32[1,128], index: 6, kind: input, shape index: {}]   ;;  %s3686_s7 = inlined_call_operand.vmem [shape: f32[1,128], index: 7, kind: input, shape index: {}]   ;;  %s3687_s8 = inlined_call_operand.hbm [shape: f32[128,256], index: 8, kind: input, shape index: {}]   ;;  %s3688_s9 = inlined_call_operand.hbm [shape: f32[128,128], index: 9, kind: input, shape index: {}]   ;;  %s3689_s10 = inlined_call_operand.hbm [shape: f32[128,256], index: 10, kind: input, shape index: {}]   ;;  %s3690_s11 = inlined_call_operand.hbm [shape: f32[128,256], index: 11, kind: input, shape index: {}]   ;;  %s3691_s12 = inlined_call_operand.hbm [shape: f32[256,128], index: 12, kind: input, shape index: {}]   ;;  %s3692_s13 = inlined_call_operand.hbm [shape: f32[2,16,128], index: 13, kind: output, shape index: {}]  }
   0x1   :  { %3704 = sst [smem:[#allocation28_spill]] %s3680_s1 }
   0x2   :  { %3705 = sst [smem:[#allocation29_spill]] %s3682_s3 }
   0x3   :  { %3706 = sst [smem:[#allocation30_spill]] %s3684_s5 }
   0x4   :  { %3707 = sst [smem:[#allocation31_spill]] %s3685_s6 }
   0x5   :  { %3708 = sst [smem:[#allocation32_spill]] %s3686_s7 }
   0x6   :  { %3709 = sst [smem:[#allocation33_spill]] %s3692_s13 }
   0x7   :  { %18 = vsyncpa [#allocation3], 0 }
   0x8   :  { %20 = vsyncpa [#allocation3 + $0x1], 0 }
   0x9   :  { %21 = vsyncpa [#allocation6], 0 }
   0xa   :  { %22 = vsyncpa [#allocation9], 0 }
   0xb   :  { %23 = vsyncpa [#allocation12], 0 }
   0xc   :  { %24 = vsyncpa [#allocation15], 0 }
   0xd   :  { %25 = vsyncpa [#allocation18], 0 }
   0xe   :  { %26 = vsyncpa [#allocation4], 0 }
   0xf   :  { %28 = vsyncpa [#allocation4 + $0x1], 0  ;;  %s3101_s25 = smov 0   ;;  %s3103_s26 = smov 0  }
  0x10   :  { %s3105_s27 = smov 0   ;;  %s3107_s28 = smov 0  }
  0x11 LB: > { %s3006_s29 = smov [#allocation5]   ;;  %s3122_s14 = sadd.s32 4294967295, %s3004_s28   ;;  %s3004_s28 = sphi %s3107_s28, %s3750_s28   ;;  %s3000_s27 = sphi %s3105_s27, %s3749_s27   ;;  %s2996_s26 = sphi %s3103_s26, %s3748_s26   ;;  %s2992_s25 = sphi %s3101_s25, %s3747_s25  }
  0x12   : > { %s355_s30 = sshll.u32 %s3006_s29, 4  ;;  %p2005_p0 = scmp.ge.s32.totalorder %s3004_s28, 1  ;;  %s3127_s30 = int_to_ptr.vmem [resolvable:$true] %s355_s30 }
  0x13   : > { %p3700_p1 = scmp.eq.s32.totalorder %s3122_s14, 0  ;;  %p343_p2 = scmp.lt.s32.totalorder %s3004_s28, 3 }
  0x14   : > { %s3007_s16 = smov [#allocation8]   ;;  %s3008_s19 = smov [#allocation11]  }
  0x15   : > { %p3129_p3 = pnand %p2005_p0, %p343_p2  ;;  %s381_s17 = sshll.u32 %s3007_s16, 4  ;;  %s3142_s17 = int_to_ptr.vmem [resolvable:$true] %s381_s17 }
  0x16   : > { %s416_s20 = sshll.u32 %s3008_s19, 4  ;;  %s3713_s1 = sld [smem:[#allocation28_spill]]  ;;  %s3144_s20 = int_to_ptr.vmem [resolvable:$true] %s416_s20 }
  0x17   : > { %s3710_s15 = scalar_select %p3129_p3, 1, 0 }
  0x18   : > { %p2439_p5 = pneg %p3129_p3 }
  0x19   : > { %3711 = sst [smem:[#allocation27_spill]] %s3710_s15 }
  0x1a   : > { %p3138_p6 = pnand %p2439_p5, %p3700_p1 }
  0x1c   : > { %s2636_s23 = scalar_lea.hbm %s3713_s1, 256  ;;  %p3154_p8 = pneg %p3138_p6 }
  0x1d   : > { %p2637_p7 = scmp.ne.s32.totalorder %s3713_s1, %s2636_s23  ;;  %p2643_p11 = scmp.lt.u32.totalorder %s2636_s23, %s3713_s1 }
  0x1f   : > { %p2639_p9 = pnand %p3154_p8, %p2637_p7 }
  0x21   : > { %p2640_p10 = pneg %p2639_p9 }
  0x23   : > { %p2645_p12 = pnand %p2643_p11, %p2640_p10 }
  0x25   : > { %2648 = shalt.err (!%p2645_p12)
}
  0x26   : > { %s2649_s21 = scalar_lea.vmem %s3127_s30, 256  ;;  %p2657_p5 = scmp.lt.s32.totalorder %s3127_s30, %s3127_s30 }
  0x27   : > { %p2650_p13 = scmp.ne.s32.totalorder %s3127_s30, %s2649_s21  ;;  %p2658_p4 = scmp.lt.s32.totalorder %s2649_s21, %s2649_s21 }
  0x29   : > { %p2652_p0 = pnand %p2650_p13, %p3154_p8  ;;  %p2659_p7 = por %p2658_p4, %p2657_p5 }
  0x2b   : > { %p2653_p2 = pneg %p2652_p0 }
  0x2d   : > { %p2660_p9 = pnand %p2659_p7, %p2653_p2 }
  0x2f   : > { %2663 = shalt.err (!%p2660_p9)
}
  0x30   : > { %s3696_s22 = smov 128   ;;  %s3698_s13 = smov 8  }
  0x31   : > { %2442 = dma.hbm_to_vmem [thread:$0]  (!%p3138_p6), %s3713_s1, 256, %s3127_s30, [#allocation6], %s3696_s22, %s3696_s22, %s3698_s13  }
  0x32   : > { %s3715_s3 = sld [smem:[#allocation29_spill]] }
  0x38   : > { %s2664_s21 = scalar_lea.hbm %s3715_s3, 256 }
  0x39   : > { %p2665_p4 = scmp.ne.s32.totalorder %s3715_s3, %s2664_s21  ;;  %p2671_p12 = scmp.lt.u32.totalorder %s2664_s21, %s3715_s3 }
  0x3b   : > { %p2667_p10 = pnand %p2665_p4, %p3154_p8 }
  0x3d   : > { %p2668_p11 = pneg %p2667_p10 }
  0x3f   : > { %p2673_p13 = pnand %p2671_p12, %p2668_p11 }
  0x41   : > { %2676 = shalt.err (!%p2673_p13)
}
  0x42   : > { %s2677_s30 = scalar_lea.vmem %s3142_s17, 256  ;;  %p2685_p7 = scmp.lt.s32.totalorder %s3142_s17, %s3142_s17 }
  0x43   : > { %p2678_p0 = scmp.ne.s32.totalorder %s3142_s17, %s2677_s30  ;;  %p2686_p9 = scmp.lt.s32.totalorder %s2677_s30, %s2677_s30 }
  0x45   : > { %p2680_p2 = pnand %p2678_p0, %p3154_p8  ;;  %p2687_p4 = por %p2686_p9, %p2685_p7 }
  0x47   : > { %p2681_p5 = pneg %p2680_p2 }
  0x49   : > { %p2688_p10 = pnand %p2687_p4, %p2681_p5 }
  0x4b   : > { %2691 = shalt.err (!%p2688_p10)
}
  0x4c   : > { %2448 = dma.hbm_to_vmem [thread:$0]  (!%p3138_p6), %s3715_s3, 256, %s3142_s17, [#allocation9], %s3696_s22, %s3696_s22, %s3698_s13  }
  0x4d   : > { %s2692_s23 = scalar_lea.hbm %s3687_s8, 4096 }
  0x4e   : > { %p2693_p11 = scmp.ne.s32.totalorder %s3687_s8, %s2692_s23  ;;  %p2699_p0 = scmp.lt.u32.totalorder %s2692_s23, %s3687_s8 }
  0x50   : > { %p2695_p12 = pnand %p2693_p11, %p3154_p8 }
  0x52   : > { %p2696_p13 = pneg %p2695_p12 }
  0x54   : > { %p2701_p2 = pnand %p2699_p0, %p2696_p13 }
  0x56   : > { %2704 = shalt.err (!%p2701_p2)
}
  0x57   : > { %s2705_s17 = scalar_lea.vmem %s3144_s20, 4096  ;;  %p2713_p4 = scmp.lt.s32.totalorder %s3144_s20, %s3144_s20 }
  0x58   : > { %p2706_p5 = scmp.ne.s32.totalorder %s3144_s20, %s2705_s17  ;;  %p2714_p10 = scmp.lt.s32.totalorder %s2705_s17, %s2705_s17 }
  0x5a   : > { %p2708_p7 = pnand %p2706_p5, %p3154_p8  ;;  %p2715_p11 = por %p2714_p10, %p2713_p4 }
  0x5c   : > { %p2709_p9 = pneg %p2708_p7 }
  0x5e   : > { %p2716_p12 = pnand %p2715_p11, %p2709_p9 }
  0x60   : > { %2719 = shalt.err (!%p2716_p12)
}
  0x61   : > { %s3702_s30 = smov 256   ;;  %s3012_s5 = smov 16  }
  0x62   : > { %2454 = dma.hbm_to_vmem [thread:$0]  (!%p3138_p6), %s3687_s8, 4096, %s3144_s20, [#allocation12], %s3702_s30, %s3702_s30, %s3012_s5  }
  0x63   : > { %s3013_s15 = smov [#allocation14]   ;;  %s3014_s24 = smov [#allocation7]  }
  0x64   : > { %s442_s23 = sshll.u32 %s3013_s15, 4  ;;  %s368_s29 = sshll.u32 %s3014_s24, 4  ;;  %s443_s23 = int_to_ptr.vmem [resolvable:$true] %s442_s23  ;;  %s369_s29 = int_to_ptr.vmem [resolvable:$true] %s368_s29 }
  0x65   : > { %s2720_s17 = scalar_lea.hbm %s3689_s10, 4096 }
  0x66   : > { %p2721_p13 = scmp.ne.s32.totalorder %s3689_s10, %s2720_s17  ;;  %p2727_p5 = scmp.lt.u32.totalorder %s2720_s17, %s3689_s10 }
  0x68   : > { %p2723_p0 = pnand %p2721_p13, %p3154_p8 }
  0x6a   : > { %p2724_p2 = pneg %p2723_p0 }
  0x6c   : > { %p2729_p7 = pnand %p2727_p5, %p2724_p2 }
  0x6e   : > { %2732 = shalt.err (!%p2729_p7)
}
  0x6f   : > { %s2733_s20 = scalar_lea.vmem %s443_s23, 4096  ;;  %p2741_p11 = scmp.lt.s32.totalorder %s443_s23, %s443_s23 }
  0x70   : > { %p2734_p9 = scmp.ne.s32.totalorder %s443_s23, %s2733_s20  ;;  %p2742_p12 = scmp.lt.s32.totalorder %s2733_s20, %s2733_s20 }
  0x72   : > { %p2736_p4 = pnand %p2734_p9, %p3154_p8  ;;  %p2743_p1 = por %p2742_p12, %p2741_p11 }
  0x74   : > { %p2737_p10 = pneg %p2736_p4 }
  0x76   : > { %p2744_p3 = pnand %p2743_p1, %p2737_p10 }
  0x78   : > { %2747 = shalt.err (!%p2744_p3)
}
  0x79   : > { %2460 = dma.hbm_to_vmem [thread:$0]  (!%p3138_p6), %s3689_s10, 4096, %s443_s23, [#allocation15], %s3702_s30, %s3702_s30, %s3012_s5  }
  0x7a   : > { %s2748_s6 = scalar_lea.hbm %s3681_s2, 256 }
  0x7b   : > { %p2749_p1 = scmp.ne.s32.totalorder %s3681_s2, %s2748_s6  ;;  %p2755_p0 = scmp.lt.u32.totalorder %s2748_s6, %s3681_s2 }
  0x7d   : > { %p2751_p3 = pnand %p2749_p1, %p3154_p8 }
  0x7f   : > { %p2752_p13 = pneg %p2751_p3 }
  0x81   : > { %p2757_p2 = pnand %p2755_p0, %p2752_p13 }
  0x83   : > { %2760 = shalt.err (!%p2757_p2)
}
  0x84   : > { %s2761_s21 = scalar_lea.vmem %s369_s29, 256  ;;  %p2769_p4 = scmp.lt.s32.totalorder %s369_s29, %s369_s29 }
  0x85   : > { %p2762_p5 = scmp.ne.s32.totalorder %s369_s29, %s2761_s21  ;;  %p2770_p10 = scmp.lt.s32.totalorder %s2761_s21, %s2761_s21 }
  0x87   : > { %p2764_p7 = pnand %p2762_p5, %p3154_p8  ;;  %p2771_p11 = por %p2770_p10, %p2769_p4 }
  0x89   : > { %p2765_p9 = pneg %p2764_p7 }
  0x8b   : > { %p2772_p12 = pnand %p2771_p11, %p2765_p9 }
  0x8d   : > { %2775 = shalt.err (!%p2772_p12)
}
  0x8e   : > { %s3716_s23 = smov 8   ;;  %s3717_s17 = smov 128  }
  0x8f   : > { %2445 = dma.hbm_to_vmem [thread:$0]  (!%p3138_p6), %s3681_s2, 256, %s369_s29, [#allocation6], %s3717_s17, %s3717_s17, %s3716_s23  }
  0x90   : > { %s3015_s3 = smov [#allocation10]   ;;  %s3016_s13 = smov [#allocation13]  }
  0x91   : > { %s394_s22 = sshll.u32 %s3015_s3, 4  ;;  %s429_s6 = sshll.u32 %s3016_s13, 4  ;;  %s395_s22 = int_to_ptr.vmem [resolvable:$true] %s394_s22  ;;  %s430_s6 = int_to_ptr.vmem [resolvable:$true] %s429_s6 }
  0x92   : > { %s2776_s24 = scalar_lea.hbm %s3683_s4, 256 }
  0x93   : > { %p2777_p1 = scmp.ne.s32.totalorder %s3683_s4, %s2776_s24  ;;  %p2783_p0 = scmp.lt.u32.totalorder %s2776_s24, %s3683_s4 }
  0x95   : > { %p2779_p3 = pnand %p2777_p1, %p3154_p8 }
  0x97   : > { %p2780_p13 = pneg %p2779_p3 }
  0x99   : > { %p2785_p2 = pnand %p2783_p0, %p2780_p13 }
  0x9b   : > { %2788 = shalt.err (!%p2785_p2)
}
  0x9c   : > { %s2789_s29 = scalar_lea.vmem %s395_s22, 256  ;;  %p2797_p4 = scmp.lt.s32.totalorder %s395_s22, %s395_s22 }
  0x9d   : > { %p2790_p5 = scmp.ne.s32.totalorder %s395_s22, %s2789_s29  ;;  %p2798_p10 = scmp.lt.s32.totalorder %s2789_s29, %s2789_s29 }
  0x9f   : > { %p2792_p7 = pnand %p2790_p5, %p3154_p8  ;;  %p2799_p11 = por %p2798_p10, %p2797_p4 }
  0xa1   : > { %p2793_p9 = pneg %p2792_p7 }
  0xa3   : > { %p2800_p12 = pnand %p2799_p11, %p2793_p9 }
  0xa5   : > { %2803 = shalt.err (!%p2800_p12)
}
  0xa6   : > { %2451 = dma.hbm_to_vmem [thread:$0]  (!%p3138_p6), %s3683_s4, 256, %s395_s22, [#allocation9], %s3717_s17, %s3717_s17, %s3716_s23  }
  0xa7   : > { %s2804_s7 = scalar_lea.hbm %s3688_s9, 2048 }
  0xa8   : > { %p2805_p1 = scmp.ne.s32.totalorder %s3688_s9, %s2804_s7  ;;  %p2811_p0 = scmp.lt.u32.totalorder %s2804_s7, %s3688_s9 }
  0xaa   : > { %p2807_p3 = pnand %p2805_p1, %p3154_p8 }
  0xac   : > { %p2808_p13 = pneg %p2807_p3 }
  0xae   : > { %p2813_p2 = pnand %p2811_p0, %p2808_p13 }
  0xb0   : > { %2816 = shalt.err (!%p2813_p2)
}
  0xb1   : > { %s2817_s20 = scalar_lea.vmem %s430_s6, 2048  ;;  %p2825_p4 = scmp.lt.s32.totalorder %s430_s6, %s430_s6 }
  0xb2   : > { %p2818_p5 = scmp.ne.s32.totalorder %s430_s6, %s2817_s20  ;;  %p2826_p10 = scmp.lt.s32.totalorder %s2817_s20, %s2817_s20 }
  0xb4   : > { %p2820_p7 = pnand %p2818_p5, %p3154_p8  ;;  %p2827_p11 = por %p2826_p10, %p2825_p4 }
  0xb6   : > { %p2821_p9 = pneg %p2820_p7 }
  0xb8   : > { %p2828_p12 = pnand %p2827_p11, %p2821_p9 }
  0xba   : > { %2831 = shalt.err (!%p2828_p12)
}
  0xbb   : > { %2457 = dma.hbm_to_vmem [thread:$0]  (!%p3138_p6), %s3688_s9, 2048, %s430_s6, [#allocation12], %s3717_s17, %s3717_s17, %s3716_s23  }
  0xbc   : > { %s3017_s30 = smov [#allocation16]   ;;  %s3018_s3 = smov [#allocation17]  }
  0xbd   : > { %s455_s1 = sshll.u32 %s3017_s30, 4  ;;  %s468_s13 = sshll.u32 %s3018_s3, 4  ;;  %s456_s1 = int_to_ptr.vmem [resolvable:$true] %s455_s1  ;;  %s469_s13 = int_to_ptr.vmem [resolvable:$true] %s468_s13 }
  0xbe   : > { %s2832_s24 = scalar_lea.hbm %s3690_s11, 4096 }
  0xbf   : > { %p2833_p1 = scmp.ne.s32.totalorder %s3690_s11, %s2832_s24  ;;  %p2839_p0 = scmp.lt.u32.totalorder %s2832_s24, %s3690_s11 }
  0xc1   : > { %p2835_p3 = pnand %p2833_p1, %p3154_p8 }
  0xc3   : > { %p2836_p13 = pneg %p2835_p3 }
  0xc5   : > { %p2841_p2 = pnand %p2839_p0, %p2836_p13 }
  0xc7   : > { %2844 = shalt.err (!%p2841_p2)
}
  0xc8   : > { %s2845_s6 = scalar_lea.vmem %s456_s1, 4096  ;;  %p2853_p4 = scmp.lt.s32.totalorder %s456_s1, %s456_s1 }
  0xc9   : > { %p2846_p5 = scmp.ne.s32.totalorder %s456_s1, %s2845_s6  ;;  %p2854_p10 = scmp.lt.s32.totalorder %s2845_s6, %s2845_s6 }
  0xcb   : > { %p2848_p7 = pnand %p2846_p5, %p3154_p8  ;;  %p2855_p11 = por %p2854_p10, %p2853_p4 }
  0xcd   : > { %p2849_p9 = pneg %p2848_p7 }
  0xcf   : > { %p2856_p12 = pnand %p2855_p11, %p2849_p9 }
  0xd1   : > { %2859 = shalt.err (!%p2856_p12)
}
  0xd2   : > { %s3718_s29 = smov 256   ;;  %s2860_s24 = scalar_lea.hbm %s3691_s12, 4096 }
  0xd3   : > { %2463 = dma.hbm_to_vmem [thread:$0]  (!%p3138_p6), %s3690_s11, 4096, %s456_s1, [#allocation15], %s3718_s29, %s3718_s29, %s3012_s5  }
  0xd4   : > { %p2861_p1 = scmp.ne.s32.totalorder %s3691_s12, %s2860_s24  ;;  %p2867_p0 = scmp.lt.u32.totalorder %s2860_s24, %s3691_s12 }
  0xd6   : > { %p2863_p3 = pnand %p2861_p1, %p3154_p8 }
  0xd8   : > { %p2864_p13 = pneg %p2863_p3 }
  0xda   : > { %p2869_p2 = pnand %p2867_p0, %p2864_p13 }
  0xdc   : > { %2872 = shalt.err (!%p2869_p2)
}
  0xdd   : > { %s2873_s6 = scalar_lea.vmem %s469_s13, 4096  ;;  %p2881_p4 = scmp.lt.s32.totalorder %s469_s13, %s469_s13 }
  0xde   : > { %p2874_p5 = scmp.ne.s32.totalorder %s469_s13, %s2873_s6  ;;  %p2882_p10 = scmp.lt.s32.totalorder %s2873_s6, %s2873_s6 }
  0xe0   : > { %p2876_p7 = pnand %p2874_p5, %p3154_p8  ;;  %p2883_p11 = por %p2882_p10, %p2881_p4 }
  0xe2   : > { %p2877_p9 = pneg %p2876_p7 }
  0xe4   : > { %p2884_p12 = pnand %p2883_p11, %p2877_p9 }
  0xe6   : > { %2887 = shalt.err (!%p2884_p12)
}
  0xe7   : > { %2466 = dma.hbm_to_vmem [thread:$0]  (!%p3138_p6), %s3691_s12, 4096, %s469_s13, [#allocation18], %s3717_s17, %s3717_s17, %s3716_s23  }
  0xe8   : > { %s2004_s18 = sadd.s32 4294967294, %s3004_s28   ;;  %s3358_s16 = sadd.s32 1, %s3004_s28  }
  0xe9   : > { %s41_s29 = sadd.s32 1, %s3000_s27  ;;  %s38_s30 = ssub.s32 %s3004_s28, %s3358_s16 }
  0xea   : > { %p48_p8 = scmp.ne.s32.totalorder %s3000_s27, %s2996_s26  ;;  %p39_p1 = scmp.eq.s32.totalorder %s38_s30, 0 }
  0xeb   : > { %p49_p3 = scmp.eq.s32.totalorder %s3004_s28, 0  ;;  %p54_p13 = scmp.ne.s32.totalorder %s2996_s26, %s2992_s25 }
  0xec   : > { %p330_p0 = scmp.eq.s32.totalorder %s3122_s14, 1  ;;  %p3719_p5 = scmp.eq.s32.totalorder %s3122_s14, 0 }
  0xed   : > { %s3370_s3 = scalar_select %p39_p1, %s3000_s27, %s41_s29  }
  0xee   : > { %p50_p2 = por %p49_p3, %p48_p8  ;;  %p3374_p7 = por %p3719_p5, %p54_p13 }
  0xef   : > { %p3378_p6 = por %p330_p0, %p48_p8  ;;  %p336_p9 = scmp.eq.s32.totalorder %s2004_s18, 1 }
  0xf0   : > { %p2484_p4 = scmp.lt.s32.totalorder %s3004_s28, 2  ;;  %s482_s15 = sand.u32 1, %s3000_s27  }
  0xf1   : > { %s3721_s13 = scalar_select %p3378_p6, 1, 0 }
  0xf2   : > { %p3384_p10 = por %p336_p9, %p54_p13  ;;  %s2016_s19 = sshll.u32 %s482_s15, 4 }
  0xf3   : > { %s2062_s21 = sshll.u32 %s3004_s28, 8  ;;  %s486_s5 = scalar_lea.vmem [#allocation2], %s2016_s19 }
  0xf4   : > { %s3722_s24 = scalar_select %p3384_p10, 1, 0 }
  0xf5   : > { %s3392_s6 = scalar_lea.hbm %s3679_s0, %s2062_s21  ;;  %s493_s1 = sshll.u32 %s486_s5, 4  ;;  %s3398_s1 = int_to_ptr.vmem [resolvable:$true] %s493_s1 }
  0xf6   : > { %p3394_p11 = pnand %p2484_p4, %p50_p2  ;;  %s3400_s29 = scalar_lea.sflag [#allocation3], %s482_s15 }
  0xf7   : > { %s2888_s30 = scalar_lea.hbm %s3392_s6, 256  ;;  %s2893_s20 = scalar_lea.hbm %s3679_s0, 512 }
  0xf8   : > { %p2889_p12 = scmp.ne.s32.totalorder %s3392_s6, %s2888_s30  ;;  %p2890_p8 = pneg %p3394_p11 }
  0xf9   : > { %p2894_p13 = scmp.lt.u32.totalorder %s3392_s6, %s3679_s0  ;;  %p2895_p0 = scmp.lt.u32.totalorder %s2893_s20, %s2888_s30 }
  0xfa   : > { %p2891_p1 = pnand %p2890_p8, %p2889_p12  ;;  %p2897_p5 = scmp.lt.u32.totalorder %s2888_s30, %s3392_s6 }
  0xfb   : > { %p2896_p2 = por %p2895_p0, %p2894_p13 }
  0xfc   : > { %p2892_p3 = pneg %p2891_p1 }
  0xfd   : > { %p2898_p9 = por %p2897_p5, %p2896_p2 }
  0xff   : > { %p2899_p4 = pnand %p2898_p9, %p2892_p3 }
 0x101   : > { %2902 = shalt.err (!%p2899_p4)
}
 0x102   : > { %s2903_s15 = scalar_lea.vmem %s3398_s1, 256  ;;  %s3019_s19 = smov [#allocation2]  }
 0x103   : > { %p2904_p12 = scmp.ne.s32.totalorder %s3398_s1, %s2903_s15  ;;  %s2908_s21 = sshll.u32 %s3019_s19, 4  ;;  %s2909_s21 = int_to_ptr.vmem [resolvable:$false] %s2908_s21 }
 0x104   : > { %s2910_s22 = scalar_lea.vmem %s2909_s21, 512  ;;  %p2911_p6 = scmp.lt.s32.totalorder %s3398_s1, %s2909_s21 }
 0x105   : > { %p2906_p1 = pnand %p2904_p12, %p2890_p8  ;;  %p2912_p13 = scmp.lt.s32.totalorder %s2910_s22, %s2903_s15 }
 0x107   : > { %p2907_p10 = pneg %p2906_p1  ;;  %p2913_p0 = por %p2912_p13, %p2911_p6 }
 0x109   : > { %p2914_p2 = pnand %p2913_p0, %p2907_p10 }
 0x10b   : > { %2917 = shalt.err (!%p2914_p2)
}
 0x10c   : > { %2470 = dma.hbm_to_vmem [thread:$0]  (!%p3394_p11), %s3392_s6, 256, %s3398_s1, %s3400_s29, %s3717_s17, %s3717_s17, %s3716_s23  }
 0x10d   : > { %s3724_s30 = sld [smem:[#allocation27_spill]] }
 0x113   : > { %p3725_p8 = scmp.ne.s32.totalorder %s3724_s30, 0 }
 0x114   : > { %s3434_s20 = sand.u32 (!%p3725_p8), 1, %s2996_s26  }
 0x115   : > { %505 = sbr.rel (%p3725_p8) target bundleno = 2875 (0xb3b), region = 72  ;;  %s2020_s5 = sshll.u32 (!%p3725_p8), %s3434_s20, 4 }
 0x116   : > { %s508_s15 = scalar_lea.sflag (!%p3725_p8), [#allocation3], %s3434_s20  ;;  %s511_s18 = scalar_lea.vmem (!%p3725_p8), [#allocation2], %s2020_s5 }
 0x11c   : > { %2963 = dma.done.wait (%p3374_p7), %s508_s15, 256  }
 0x11d   : > { %2965 = vsyncadd (%p3374_p7), %s508_s15, 4294967040  ;;  %p3726_p6 = scmp.eq.s32.totalorder %s3122_s14, 0 }
 0x11f   : > { %2967 = dma.done.wait (%p3726_p6), [#allocation6], 512   ;;  %p3727_p10 = pmov %p3726_p6 }
 0x120   : > { %p3728_p11 = pmov %p3726_p6 }
 0x121   : > { %2969 = vsyncadd (%p3727_p10), [#allocation6], 4294966784 }
 0x122   : > { %2971 = dma.done.wait (%p3728_p11), [#allocation9], 512   ;;  %p3729_p3 = pmov %p3726_p6 }
 0x124   : > { %2973 = vsyncadd (%p3729_p3), [#allocation9], 4294966784  ;;  %p3730_p5 = pmov %p3729_p3 }
 0x125   : > { %p3731_p9 = pmov %p3729_p3 }
 0x126   : > { %2975 = dma.done.wait (%p3730_p5), [#allocation12], 6144  }
 0x127   : > { %2977 = vsyncadd (%p3731_p9), [#allocation12], 4294961152  ;;  %p3732_p7 = pmov %p3729_p3 }
 0x128   : > { %p3733_p4 = pmov %p3729_p3 }
 0x129   : > { %2979 = dma.done.wait (%p3732_p7), [#allocation15], 8192  }
 0x12a   : > { %2981 = vsyncadd (%p3733_p4), [#allocation15], 4294959104  ;;  %p3734_p12 = pmov %p3729_p3 }
 0x12b   : > { %p3735_p1 = pmov %p3729_p3 }
 0x12c   : > { %2983 = dma.done.wait (%p3734_p12), [#allocation18], 4096  }
 0x12d   : > { %2985 = vsyncadd (%p3735_p1), [#allocation18], 4294963200  ;;  %v3464_v0 = vld [vmem:[%s511_s18] sm:$0xff]  ;;  %v3466_v1 = vld [vmem:[%s511_s18 + $0x8] sm:$0xff]  ;;  %v3020_v47 = vmov 0.0   ;;  %s3736_s7 = sld [smem:[#allocation31_spill]] }
 0x12e   : > { %v617_v2 = vld [vmem:[#allocation11 + $0x8] sm:$0xff]  ;;  %v593_v3 = vmul.f32 %v3464_v0, %v3464_v0  ;;  %v619_v4 = vld [vmem:[#allocation11 + $0x18] sm:$0xff]  ;;  %v616_v5 = vld [vmem:[#allocation11] sm:$0xff]  ;;  %v594_v12 = vmul.f32 %v3466_v1, %v3466_v1  ;;  %712 = vmatprep.mubr.f32.mxu0 %v3020_v47  ;;  %s3021_s6 = smov 127   ;;  %s3022_s1 = smov 1   ;;  %vm818_vm1 = vcmask 261120  }
 0x12f   : > { %v618_v6 = vld [vmem:[#allocation11 + $0x10] sm:$0xff]  ;;  %v2219_v7 = vpack.c.bf16 %v619_v4, %v617_v2  ;;  %v621_v9 = vld [vmem:[#allocation11 + $0x28] sm:$0xff]  ;;  %v623_v10 = vld [vmem:[#allocation11 + $0x38] sm:$0xff]  ;;  %s3023_s29 = smov 65   ;;  %s3024_s19 = smov 63   ;;  %vm758_vm2 = vcmask 7168  }
 0x130   : > { %v2221_v8 = vpack.c.bf16 %v618_v6, %v616_v5  ;;  %v620_v11 = vld [vmem:[#allocation11 + $0x20] sm:$0xff]  ;;  %595 = vadd.xlane.f32.xlu0 %v593_v3  ;;  %v2223_v13 = vpack.c.bf16 %v623_v10, %v621_v9  ;;  %v622_v14 = vld [vmem:[#allocation11 + $0x30] sm:$0xff]  ;;  %v625_v15 = vld [vmem:[#allocation11 + $0x48] sm:$0xff]  ;;  %v729_v9 = vlaneseq  ;;  %s3025_s21 = smov 96   ;;  %vm785_vm3 = vcmask 515072   ;;  %s3741_s15 = sld [smem:[#allocation30_spill]] }
 0x131   : > { %v627_v16 = vld [vmem:[#allocation11 + $0x58] sm:$0xff]  ;;  %2220 = vmatprep.subr.bf16.mxu0 %v2219_v7  ;;  %v2225_v17 = vpack.c.bf16 %v622_v14, %v620_v11  ;;  %v624_v19 = vld [vmem:[#allocation11 + $0x40] sm:$0xff]  ;;  %v626_v20 = vld [vmem:[#allocation11 + $0x50] sm:$0xff]  ;;  %vm918_vm5 = vcmask 130048   ;;  %s3026_s17 = smov 64   ;;  %vm1348_vm6 = vcmask 523264  }
 0x132   : > { %2222 = vmatpush1.bf16.msra.mxu0 %v2221_v8  ;;  %v2227_v18 = vpack.c.bf16 %v627_v16, %v625_v15  ;;  %v629_v21 = vld [vmem:[#allocation11 + $0x68] sm:$0xff]  ;;  %v631_v22 = vld [vmem:[#allocation11 + $0x78] sm:$0xff]  ;;  %v2229_v23 = vpack.c.bf16 %v626_v20, %v624_v19  ;;  %v628_v25 = vld [vmem:[#allocation11 + $0x60] sm:$0xff]  ;;  %v730_v10 = vand.u32 127, %v729_v9  ;;  %vm1351_vm7 = vcmask 785408   ;;  %s2063_s22 = sshll.u32 %s3122_s14, 8 }
 0x133   : > { %2224 = vmatprep.subr.bf16.mxu0 %v2223_v13  ;;  %v2231_v24 = vpack.c.bf16 %v631_v22, %v629_v21  ;;  %v630_v26 = vld [vmem:[#allocation11 + $0x70] sm:$0xff]  ;;  %v633_v28 = vld [vmem:[#allocation11 + $0x88] sm:$0xff]  ;;  %v635_v29 = vld [vmem:[#allocation11 + $0x98] sm:$0xff]  ;;  %s3743_s23 = sld [smem:[#allocation33_spill]]  ;;  %p3744_p0 = scmp.ne.s32.totalorder %s3721_s13, 0 }
 0x134   : > { %597 = vadd.xlane.f32.xlu0 %v594_v12  ;;  %v2233_v27 = vpack.c.bf16 %v630_v26, %v628_v25  ;;  %v2235_v30 = vpack.c.bf16 %v635_v29, %v633_v28  ;;  %v632_v31 = vld [vmem:[#allocation11 + $0x80] sm:$0xff]  ;;  %v634_v32 = vld [vmem:[#allocation11 + $0x90] sm:$0xff]  ;;  %v637_v34 = vld [vmem:[#allocation11 + $0xa8] sm:$0xff]  ;;  %v735_v11 = vand.u32 1, %v730_v10  ;;  %s3028_s14 = smov [#allocation19]  }
 0x135   : > { %v2237_v33 = vpack.c.bf16 %v634_v32, %v632_v31  ;;  %v639_v35 = vld [vmem:[#allocation11 + $0xb8] sm:$0xff]  ;;  %v636_v37 = vld [vmem:[#allocation11 + $0xa0] sm:$0xff]  ;;  %v638_v38 = vld [vmem:[#allocation11 + $0xb0] sm:$0xff] }
 0x136   : > { %2226 = vmatpush1.bf16.msra.mxu0 %v2225_v17  ;;  %v2239_v36 = vpack.c.bf16 %v639_v35, %v637_v34  ;;  %v2241_v39 = vpack.c.bf16 %v638_v38, %v636_v37  ;;  %v641_v40 = vld [vmem:[#allocation11 + $0xc8] sm:$0xff]  ;;  %v643_v41 = vld [vmem:[#allocation11 + $0xd8] sm:$0xff]  ;;  %v640_v42 = vld [vmem:[#allocation11 + $0xc0] sm:$0xff]  ;;  %vm3488_vm0 = vcmp.eq.s32.totalorder %v735_v11, 0 }
 0x137   : > { %2228 = vmatprep.subr.bf16.mxu0 %v2227_v18  ;;  %v2243_v43 = vpack.c.bf16 %v643_v41, %v641_v40  ;;  %v642_v44 = vld [vmem:[#allocation11 + $0xd0] sm:$0xff]  ;;  %v645_v45 = vld [vmem:[#allocation11 + $0xe8] sm:$0xff]  ;;  %v647_v46 = vld [vmem:[#allocation11 + $0xf8] sm:$0xff] }
 0x138   : > { %v2245_v48 = vpack.c.bf16 %v642_v44, %v640_v42  ;;  %v2247_v49 = vpack.c.bf16 %v647_v46, %v645_v45  ;;  %v644_v50 = vld [vmem:[#allocation11 + $0xe0] sm:$0xff]  ;;  %v646_v51 = vld [vmem:[#allocation11 + $0xf0] sm:$0xff]  ;;  %v726_v20 = vld [vmem:[#allocation5 + $0x8] sm:$0xff] }
 0x139   : > { %v2249_v52 = vpack.c.bf16 %v646_v51, %v644_v50  ;;  %v2031_v60 = vld [vmem:[%s3736_s7] ss:$0 sm:$0xff]  ;;  %v727_v15 = vld [vmem:[#allocation7] sm:$0xff]  ;;  %v728_v21 = vld [vmem:[#allocation7 + $0x8] sm:$0xff]  ;;  %s3027_s7 = smov 32  }
 0x13a   : > { %2230 = vmatpush1.bf16.msra.mxu0 %v2229_v23  ;;  %v725_v14 = vld [vmem:[#allocation5] sm:$0xff]  ;;  %v770_v38 = vld [vmem:[#allocation10 + $0x8] sm:$0xff]  ;;  %v769_v40 = vld [vmem:[#allocation10] sm:$0xff] }
 0x13b   : > { %2232 = vmatprep.subr.bf16.mxu0 %v2231_v24  ;;  %v767_v42 = vld [vmem:[#allocation8] sm:$0xff]  ;;  %vm3510_vm4 = vmpackc.low %vm818_vm1, %vm818_vm1 }
 0x13e   : > { %2234 = vmatpush1.bf16.msra.mxu0 %v2233_v27 }
 0x13f   : > { %2236 = vmatprep.subr.bf16.mxu0 %v2235_v30 }
 0x142   : > { %2238 = vmatpush1.bf16.msra.mxu0 %v2237_v33 }
 0x143   : > { %2240 = vmatprep.subr.bf16.mxu0 %v2239_v36 }
 0x146   : > { %2242 = vmatpush1.bf16.msra.mxu0 %v2241_v39 }
 0x147   : > { %2244 = vmatprep.subr.bf16.mxu0 %v2243_v43  ;;  %v768_v43 = vld [vmem:[#allocation8 + $0x8] sm:$0xff] }
 0x14a   : > { %2246 = vmatpush1.bf16.msra.mxu0 %v2245_v48 }
 0x14b   : > { %2248 = vmatprep.subr.bf16.mxu0 %v2247_v49 }
 0x14e   : > { %2250 = vmatpush1.bf16.msra.mxu0 %v2249_v52 }
 0x1bd   : > { %v596_v53 = vpop.xlane.xlu0 %595 }
 0x1be   : > { %v600_v54 = vmul.f32 0.0078125, %v596_v53 }
 0x1c0   : > { %v602_v55 = vadd.f32 1e-05, %v600_v54 }
 0x1c1   : > { %v598_v56 = vpop.xlane.xlu0 %597 }
 0x1c2   : > { %2580 = vrsqrt.f32 %v602_v55  ;;  %v601_v57 = vmul.f32 0.0078125, %v598_v56 }
 0x1c4   : > { %v603_v58 = vadd.f32 1e-05, %v601_v57 }
 0x1c6   : > { %2582 = vrsqrt.f32 %v603_v58 }
 0x1cc   : > { %v2581_v59 = vpop.eup %2580 }
 0x1cd   : > { %v606_v61 = vmul.f32 %v2581_v59, %v3464_v0  ;;  %v3524_v59 = vld [vmem:[%s3741_s15 + $0x8] sm:$0xff] }
 0x1cf   : > { %v614_v62 = vmul.f32 %v2031_v60, %v606_v61 }
 0x1d0   : > { %v2583_v63 = vpop.eup %2582 }
 0x1d1   : > { %713 = vmatmul.mubr.f32.vlgmr.msra.gmra.mrb[0].mxu0 %v614_v62  ;;  %v607_v2 = vmul.f32 %v2583_v63, %v3466_v1 }
 0x1d2   : > { %718 = vmatprep.mubr.f32.mxu0 %v3020_v47 }
 0x1d3   : > { %v615_v3 = vmul.f32 %v2031_v60, %v607_v2  ;;  %v3529_v60 = vld [vmem:[%s3741_s15] sm:$0xff] }
 0x1d5   : > { %719 = vmatmul.mubr.f32.gmra.mrb[2].mxu0 %v615_v3 }
 0x2a4   : > { %v714_v4 = vpop.f32.mrb[0].mxu0 }
 0x2a5   : > { %746 = vrot.lane.b32.xlu1 %v714_v4, %s3021_s6  ;;  %v3479_v5 = vpop.f32.mrb[1].mxu0  ;;  %v761_v18 = vmul.f32 %v725_v14, %v714_v4 }
 0x2a6   : > { %v804_v50 = vmul.f32 %v767_v42, %v3479_v5 }
 0x2a8   : > { %v720_v6 = vpop.f32.mrb[2].mxu0 }
 0x2a9   : > { %752 = vrot.lane.b32.xlu1 %v714_v4, %s3022_s1  ;;  %748 = vrot.lane.b32.xlu0 %v720_v6, %s3021_s6  ;;  %v722_v7 = vpop.f32.mrb[3].mxu0  ;;  %v762_v26 = vmul.f32 %v726_v20, %v720_v6 }
 0x2aa   : > { %v3482_v8 = vpack.i.bf16 %v722_v7, %v3479_v5  ;;  %v805_v51 = vmul.f32 %v768_v43, %v722_v7 }
 0x2ad   : > { %754 = vrot.lane.b32.xlu1 %v720_v6, %s3022_s1  ;;  %790 = vrot.lane.b32.xlu0 %v722_v7, %s3023_s29 }
 0x2b1   : > { %773 = vrot.lane.b32.xlu1 %v3479_v5, %s3021_s6  ;;  %796 = vrot.lane.b32.xlu0 %v722_v7, %s3022_s1 }
 0x2b5   : > { %779 = vrot.lane.b32.xlu1 %v3479_v5, %s3024_s19 }
 0x2b9   : > { %788 = vrot.lane.b32.xlu1 %v3479_v5, %s3023_s29  ;;  %s3742_s29 = sld [smem:[#allocation32_spill]] }
 0x2bd   : > { %775 = vrot.lane.b32.xlu1 %v722_v7, %s3021_s6  ;;  %s2922_s6 = sshll.u32 %s3028_s14, 4  ;;  %s2923_s6 = int_to_ptr.vmem [resolvable:$false] %s2922_s6 }
 0x2c1   : > { %781 = vrot.lane.b32.xlu1 %v722_v7, %s3024_s19  ;;  %s589_s19 = scalar_lea.vmem [#allocation19], %s2020_s5  ;;  %s1832_s5 = scalar_lea.sflag [#allocation4], %s3434_s20 }
 0x2c5   : > { %794 = vrot.lane.b32.xlu1 %v3479_v5, %s3022_s1  ;;  %s2924_s1 = scalar_lea.vmem %s2923_s6, 512 }
 0x317   : > { %v747_v12 = vpop.permute.xlu1 %746 }
 0x31b   : > { %v753_v16 = vpop.permute.xlu1 %752  ;;  %v749_v22 = vpop.permute.xlu0 %748 }
 0x31c   : > { %v759_v17 = vsel %vm3488_vm0, %v747_v12, %v753_v16 }
 0x31d   : > { %v763_v19 = vmul.f32 %v759_v17, %v727_v15 }
 0x31f   : > { %v755_v23 = vpop.permute.xlu1 %754  ;;  %v3494_v24 = vadd.f32 %v763_v19, %v761_v18  ;;  %v791_v31 = vpop.permute.xlu0 %790 }
 0x320   : > { %v760_v25 = vsel %vm3488_vm0, %v749_v22, %v755_v23 }
 0x321   : > { %v764_v27 = vmul.f32 %v760_v25, %v728_v21  ;;  %2148 = vmatprep.mubr.msk.f32.mxu1 %vm818_vm1, %v3494_v24  ;;  %814 = vrot.lane.b32.xlu1 %v3494_v24, %s3025_s21 }
 0x323   : > { %v774_v28 = vpop.permute.xlu1 %773  ;;  %v766_v29 = vadd.f32 %v764_v27, %v762_v26  ;;  %v797_v34 = vpop.permute.xlu0 %796 }
 0x324   : > { %v801_v36 = vsel %vm758_vm2, %v791_v31, %v797_v34 }
 0x325   : > { %816 = vrot.lane.b32.xlu0 %v766_v29, %s3025_s21 }
 0x327   : > { %v780_v30 = vpop.permute.xlu1 %779 }
 0x328   : > { %v786_v44 = vsel %vm785_vm3, %v774_v28, %v780_v30 }
 0x32b   : > { %v789_v32 = vpop.permute.xlu1 %788 }
 0x32f   : > { %v776_v33 = vpop.permute.xlu1 %775 }
 0x333   : > { %v782_v35 = vpop.permute.xlu1 %781 }
 0x334   : > { %v787_v37 = vsel %vm785_vm3, %v776_v33, %v782_v35 }
 0x335   : > { %v803_v39 = vsel %vm3488_vm0, %v787_v37, %v801_v36 }
 0x336   : > { %v807_v45 = vmul.f32 %v803_v39, %v770_v38 }
 0x337   : > { %v795_v41 = vpop.permute.xlu1 %794 }
 0x338   : > { %v800_v46 = vsel %vm758_vm2, %v789_v32, %v795_v41  ;;  %v809_v53 = vadd.f32 %v807_v45, %v805_v51 }
 0x339   : > { %v802_v48 = vsel %vm3488_vm0, %v786_v44, %v800_v46 }
 0x33a   : > { %v806_v49 = vmul.f32 %v802_v48, %v769_v40 }
 0x33c   : > { %v808_v52 = vadd.f32 %v806_v49, %v804_v50 }
 0x33e   : > { %v2251_v55 = vpack.c.bf16 %v809_v53, %v808_v52  ;;  %v2555_v56 = vpack.i.bf16 %v809_v53, %v808_v52 }
 0x340   : > { %2253 = vmatprep.subr.msk.bf16.mxu1 %vm3510_vm4, %v2251_v55 }
 0x341   : > { %2256 = vmatpush3.bf16.xpose.msk.msra.mxu1 %vm3510_vm4, %v2251_v55 }
 0x348   : > { %2149 = vmatmul.mubr.msk.f32.vlgmr.msra.gmra.mrb[0].mxu1 %vm818_vm1, %v766_v29 }
 0x393   : > { %v815_v57 = vpop.permute.xlu1 %814 }
 0x394   : > { %2151 = vmatprep.mubr.msk.f32.mxu1 %vm818_vm1, %v815_v57 }
 0x397   : > { %v817_v58 = vpop.permute.xlu0 %816 }
 0x398   : > { %2152 = vmatmul.mubr.msk.f32.gmra.mrb[2].mxu1 %vm818_vm1, %v817_v58 }
 0x41b   : > { %v2150_v61 = vpop.f32.mrb[0].mxu1 }
 0x41c   : > { %v905_v62 = vadd.f32 %v2150_v61, %v3524_v59  ;;  %v899_v63 = vpop.f32.mrb[1].mxu1 }
 0x41d   : > { %v900_v2 = vadd.f32 %v899_v63, %v3529_v60 }
 0x41e   : > { %v922_v3 = vsel %vm918_vm5, %v905_v62, -inf }
 0x41f   : > { %923 = vmax.xlane.f32.xlu0 %v922_v3  ;;  %v919_v4 = vsel %vm918_vm5, %v900_v2, -inf }
 0x420   : > { %920 = vmax.xlane.f32.xlu1 %v919_v4 }
 0x46b   : > { %v2153_v5 = vpop.f32.mrb[2].mxu1 }
 0x46c   : > { %v915_v6 = vadd.f32 %v2153_v5, %v3524_v59  ;;  %v909_v7 = vpop.f32.mrb[3].mxu1 }
 0x46d   : > { %v910_v9 = vadd.f32 %v909_v7, %v3529_v60 }
 0x46e   : > { %v928_v10 = vsel %vm918_vm5, %v915_v6, -inf }
 0x46f   : > { %929 = vmax.xlane.f32.xlu1 %v928_v10  ;;  %v925_v11 = vsel %vm918_vm5, %v910_v9, -inf }
 0x470   : > { %926 = vmax.xlane.f32.xlu0 %v925_v11 }
 0x480   : > { %2556 = vrot.lane.b32.xlu1 %v2555_v56, %s3025_s21 }
 0x484   : > { %1066 = vrot.lane.b32.xlu1 %v3494_v24, %s3026_s17 }
 0x486   : > { %2551 = vrot.lane.b32.xlu0 %v3482_v8, %s3026_s17 }
 0x488   : > { %1070 = vrot.lane.b32.xlu1 %v815_v57, %s3026_s17 }
 0x48a   : > { %1068 = vrot.lane.b32.xlu0 %v766_v29, %s3026_s17 }
 0x48e   : > { %1072 = vrot.lane.b32.xlu0 %v817_v58, %s3026_s17 }
 0x4ac   : > { %v924_v16 = vpop.xlane.xlu0 %923 }
 0x4ad   : > { %v921_v12 = vpop.xlane.xlu1 %920  ;;  %v932_v17 = vsub.f32 %v905_v62, %v924_v16 }
 0x4ae   : > { %v931_v13 = vsub.f32 %v900_v2, %v921_v12 }
 0x4af   : > { %v937_v18 = vmul.f32 1.442695, %v932_v17 }
 0x4b0   : > { %v935_v14 = vmul.f32 1.442695, %v931_v13 }
 0x4b2   : > { %2584 = vpow2.f32 %v935_v14 }
 0x4b3   : > { %2586 = vpow2.f32 %v937_v18 }
 0x4bc   : > { %v3547_v15 = vpop.eup %2584 }
 0x4bd   : > { %2158 = vmatprep.mubr.msk.f32.mxu1 %vm918_vm5, %v3547_v15  ;;  %v3553_v33 = vpop.eup %2586 }
 0x4fc   : > { %v930_v19 = vpop.xlane.xlu1 %929 }
 0x4fd   : > { %v934_v20 = vsub.f32 %v915_v6, %v930_v19  ;;  %v927_v21 = vpop.xlane.xlu0 %926 }
 0x4fe   : > { %v933_v22 = vsub.f32 %v910_v9, %v927_v21 }
 0x4ff   : > { %v941_v23 = vmul.f32 1.442695, %v934_v20 }
 0x500   : > { %v939_v24 = vmul.f32 1.442695, %v933_v22  ;;  %v2557_v25 = vpop.permute.xlu1 %2556 }
 0x501   : > { %v2559_v26 = vunpack.i.h.bf16 %v2557_v25  ;;  %v2552_v27 = vpop.permute.xlu0 %2551  ;;  %v2558_v28 = vunpack.i.l.bf16 %v2557_v25 }
 0x502   : > { %2588 = vpow2.f32 %v939_v24  ;;  %v2554_v29 = vunpack.i.h.bf16 %v2552_v27  ;;  %v2553_v30 = vunpack.i.l.bf16 %v2552_v27 }
 0x503   : > { %2590 = vpow2.f32 %v941_v23  ;;  %v2261_v32 = vpack.c.bf16 %v2559_v26, %v2558_v28 }
 0x504   : > { %v2257_v31 = vpack.c.bf16 %v2554_v29, %v2553_v30  ;;  %v1067_v36 = vpop.permute.xlu1 %1066  ;;  %v943_v29 = vsel %vm918_vm5, %v3547_v15, 0.0  ;;  %v946_v30 = vsel %vm918_vm5, %v3553_v33, 0.0  ;;  %v1360_v15 = vld [vmem:[#allocation13 + $0x30] sm:$0xff] }
 0x505   : > { %v1069_v37 = vpop.permute.xlu0 %1068 }
 0x506   : > { %2258 = vmatprep.subr.bf16.mxu1 %v2257_v31 }
 0x507   : > { %2260 = vmatpush3.bf16.msra.mxu1 %v2257_v31  ;;  %v1354_v31 = vld [vmem:[#allocation13] sm:$0xff] }
 0x508   : > { %2263 = vmatprep.subr.msk.bf16.mxu1 %vm3510_vm4, %v2261_v32  ;;  %v1071_v38 = vpop.permute.xlu1 %1070 }
 0x509   : > { %v1073_v39 = vpop.permute.xlu0 %1072 }
 0x50a   : > { %2159 = vmatmul.mubr.msk.f32.vlgmr.msra.gmra.mrb[4].mxu1 %vm918_vm5, %v3553_v33 }
 0x50c   : > { %v2589_v34 = vpop.eup %2588 }
 0x50d   : > { %v2591_v35 = vpop.eup %2590  ;;  %2161 = vmatprep.mubr.msk.f32.mxu1 %vm918_vm5, %v2589_v34  ;;  %v949_v57 = vsel %vm918_vm5, %v2589_v34, 0.0  ;;  %v1356_v34 = vld [vmem:[#allocation13 + $0x10] sm:$0xff] }
 0x50e   : > { %2162 = vmatmul.mubr.msk.f32.gmra.mrb[6].mxu1 %vm918_vm5, %v2591_v35  ;;  %v952_v58 = vsel %vm918_vm5, %v2591_v35, 0.0 }
 0x50f   : > { %2168 = vmatprep.mubr.msk.f32.mxu1 %vm818_vm1, %v1067_v36  ;;  %v1357_v36 = vld [vmem:[#allocation13 + $0x18] sm:$0xff] }
 0x510   : > { %2266 = vmatpush3.bf16.xpose.msk.msra.mxu1 %vm3510_vm4, %v2261_v32  ;;  %v1355_v32 = vld [vmem:[#allocation13 + $0x8] sm:$0xff] }
 0x511   : > { %v2271_v35 = vpack.c.bf16 %v1355_v32, %v1354_v31 }
 0x513   : > { %2272 = vmatprep.subr.bf16.mxu0 %v2271_v35 }
 0x514   : > { %2274 = vmatpush3.bf16.msra.mxu0 %v2271_v35 }
 0x517   : > { %2169 = vmatmul.mubr.msk.f32.vlgmr.msra.gmra.mrb[8].mxu1 %vm818_vm1, %v1069_v37  ;;  %v2275_v37 = vpack.c.bf16 %v1357_v36, %v1356_v34  ;;  %v1580_v36 = vld [vmem:[#allocation16 + $0x8] sm:$0xff] }
 0x518   : > { %2171 = vmatprep.mubr.msk.f32.mxu1 %vm818_vm1, %v1071_v38  ;;  %v1358_v38 = vld [vmem:[#allocation13 + $0x20] sm:$0xff] }
 0x519   : > { %2276 = vmatprep.subr.bf16.mxu0 %v2275_v37 }
 0x51a   : > { %2278 = vmatpush3.bf16.msra.mxu0 %v2275_v37 }
 0x51b   : > { %2172 = vmatmul.mubr.msk.f32.gmra.mrb[10].mxu1 %vm818_vm1, %v1073_v39  ;;  %v1359_v39 = vld [vmem:[#allocation13 + $0x28] sm:$0xff] }
 0x5dd   : > { %v3565_v40 = vpop.f32.mrb[4].mxu1 }
 0x5de   : > { %v3567_v41 = vpop.f32.mrb[5].mxu1 }
 0x5e1   : > { %v3569_v42 = vpop.f32.mrb[6].mxu1 }
 0x5e2   : > { %v3571_v43 = vpop.f32.mrb[7].mxu1 }
 0x5ea   : > { %v2170_v44 = vpop.f32.mrb[8].mxu1 }
 0x5eb   : > { %v1162_v45 = vadd.f32 %v2170_v44, %v3524_v59  ;;  %v1156_v46 = vpop.f32.mrb[9].mxu1  ;;  %v1362_v44 = vld [vmem:[#allocation13 + $0x40] sm:$0xff] }
 0x5ec   : > { %v1157_v48 = vadd.f32 %v1156_v46, %v3529_v60 }
 0x5ed   : > { %v1178_v49 = vsel %vm918_vm5, %v1162_v45, -inf }
 0x5ee   : > { %1179 = vmax.xlane.f32.xlu0 %v1178_v49  ;;  %v2173_v50 = vpop.f32.mrb[10].mxu1  ;;  %v1175_v51 = vsel %vm918_vm5, %v1157_v48, -inf  ;;  %v1365_v49 = vld [vmem:[#allocation13 + $0x58] sm:$0xff] }
 0x5ef   : > { %v1172_v52 = vadd.f32 %v2173_v50, %v3524_v59  ;;  %v1166_v53 = vpop.f32.mrb[11].mxu1  ;;  %1176 = vmax.xlane.f32.xlu1 %v1175_v51 }
 0x5f0   : > { %v1167_v54 = vadd.f32 %v1166_v53, %v3529_v60 }
 0x5f1   : > { %v1184_v55 = vsel %vm918_vm5, %v1172_v52, -inf }
 0x5f2   : > { %v1181_v56 = vsel %vm918_vm5, %v1167_v54, -inf }
 0x5f3   : > { %1182 = vmax.xlane.f32.xlu0 %v1181_v56  ;;  %1185 = vmax.xlane.f32.xlu1 %v1184_v55  ;;  %v1366_v55 = vld [vmem:[#allocation13 + $0x60] sm:$0xff]  ;;  %v1367_v56 = vld [vmem:[#allocation13 + $0x68] sm:$0xff] }
 0x5f7   : > { %950 = vadd.xlane.f32.xlu1 %v949_v57  ;;  %v2295_v57 = vpack.c.bf16 %v1367_v56, %v1366_v55  ;;  %v1583_v55 = vld [vmem:[#allocation16 + $0x20] sm:$0xff] }
 0x5fb   : > { %953 = vadd.xlane.f32.xlu1 %v952_v58  ;;  %v1368_v58 = vld [vmem:[#allocation13 + $0x70] sm:$0xff] }
 0x609   : > { %2561 = vrot.lane.b32.xlu0 %v3482_v8, %s3027_s7 }
 0x67b   : > { %v1180_v59 = vpop.xlane.xlu0 %1179 }
 0x67c   : > { %v1188_v61 = vsub.f32 %v1162_v45, %v1180_v59  ;;  %v1177_v62 = vpop.xlane.xlu1 %1176  ;;  %v1363_v45 = vld [vmem:[#allocation13 + $0x48] sm:$0xff]  ;;  %v1369_v59 = vld [vmem:[#allocation13 + $0x78] sm:$0xff] }
 0x67d   : > { %v1187_v60 = vsub.f32 %v1157_v48, %v1177_v62  ;;  %v2287_v46 = vpack.c.bf16 %v1363_v45, %v1362_v44  ;;  %v1364_v48 = vld [vmem:[#allocation13 + $0x50] sm:$0xff]  ;;  %v1475_v45 = vld [vmem:[#allocation14 + $0x28] sm:$0xff] }
 0x67e   : > { %v1193_v63 = vmul.f32 1.442695, %v1188_v61  ;;  %v2291_v50 = vpack.c.bf16 %v1365_v49, %v1364_v48  ;;  %v2299_v61 = vpack.c.bf16 %v1369_v59, %v1368_v58  ;;  %v1581_v44 = vld [vmem:[#allocation16 + $0x10] sm:$0xff]  ;;  %v1477_v48 = vld [vmem:[#allocation14 + $0x38] sm:$0xff]  ;;  %v1584_v49 = vld [vmem:[#allocation16 + $0x28] sm:$0xff] }
 0x67f   : > { %v1191_v2 = vmul.f32 1.442695, %v1187_v60  ;;  %v1479_v58 = vld [vmem:[#allocation14 + $0x48] sm:$0xff]  ;;  %v1481_v59 = vld [vmem:[#allocation14 + $0x58] sm:$0xff] }
 0x680   : > { %2592 = vpow2.f32 %v1193_v63  ;;  %v1183_v3 = vpop.xlane.xlu0 %1182  ;;  %v1186_v4 = vpop.xlane.xlu1 %1185 }
 0x681   : > { %2594 = vpow2.f32 %v1191_v2  ;;  %v1189_v5 = vsub.f32 %v1167_v54, %v1183_v3  ;;  %v1190_v6 = vsub.f32 %v1172_v52, %v1186_v4 }
 0x683   : > { %v1195_v7 = vmul.f32 1.442695, %v1189_v5  ;;  %v1197_v9 = vmul.f32 1.442695, %v1190_v6 }
 0x684   : > { %v2562_v10 = vpop.permute.xlu0 %2561  ;;  %v951_v11 = vpop.xlane.xlu1 %950 }
 0x685   : > { %2596 = vpow2.f32 %v1195_v7  ;;  %v2564_v12 = vunpack.i.h.bf16 %v2562_v10  ;;  %v2563_v13 = vunpack.i.l.bf16 %v2562_v10 }
 0x686   : > { %2598 = vpow2.f32 %v1197_v9 }
 0x687   : > { %v2267_v8 = vpack.c.bf16 %v2564_v12, %v2563_v13  ;;  %2600 = vrcp.f32 %v951_v11 }
 0x688   : > { %v954_v14 = vpop.xlane.xlu1 %953 }
 0x689   : > { %2602 = vrcp.f32 %v954_v14  ;;  %2268 = vmatprep.subr.bf16.mxu1 %v2267_v8 }
 0x68a   : > { %v2593_v16 = vpop.eup %2592  ;;  %2270 = vmatpush3.bf16.msra.mxu1 %v2267_v8 }
 0x68b   : > { %v2595_v17 = vpop.eup %2594  ;;  %v1202_v18 = vsel %vm918_vm5, %v2593_v16, 0.0 }
 0x68c   : > { %1203 = vadd.xlane.f32.xlu1 %v1202_v18  ;;  %2178 = vmatprep.mubr.msk.f32.mxu1 %vm918_vm5, %v2595_v17  ;;  %v1199_v20 = vsel %vm918_vm5, %v2595_v17, 0.0 }
 0x68d   : > { %2179 = vmatmul.mubr.msk.f32.vlgmr.msra.gmra.mrb[12].mxu1 %vm918_vm5, %v2593_v16 }
 0x68f   : > { %v2597_v19 = vpop.eup %2596 }
 0x690   : > { %v2599_v21 = vpop.eup %2598  ;;  %2181 = vmatprep.mubr.msk.f32.mxu1 %vm918_vm5, %v2597_v19  ;;  %1200 = vadd.xlane.f32.xlu1 %v1199_v20  ;;  %v1205_v25 = vsel %vm918_vm5, %v2597_v19, 0.0 }
 0x691   : > { %v2601_v22 = vpop.eup %2600  ;;  %2182 = vmatmul.mubr.msk.f32.gmra.mrb[14].mxu1 %vm918_vm5, %v2599_v21  ;;  %v1208_v23 = vsel %vm918_vm5, %v2599_v21, 0.0 }
 0x692   : > { %1209 = vadd.xlane.f32.xlu0 %v1208_v23  ;;  %1566 = vmatprep.mubr.f32.mxu1 %v3020_v47  ;;  %v1064_v26 = vmul.f32 %v2601_v22, %v3571_v43  ;;  %v1361_v43 = vld [vmem:[#allocation13 + $0x38] sm:$0xff] }
 0x693   : > { %v2603_v24 = vpop.eup %2602  ;;  %v2283_v33 = vpack.c.bf16 %v1361_v43, %v1360_v15 }
 0x694   : > { %1206 = vadd.xlane.f32.xlu1 %v1205_v25  ;;  %v1065_v27 = vmul.f32 %v2603_v24, %v3569_v42  ;;  %v2279_v42 = vpack.c.bf16 %v1359_v39, %v1358_v38  ;;  %v1582_v38 = vld [vmem:[#allocation16 + $0x18] sm:$0xff]  ;;  %v1470_v39 = vld [vmem:[#allocation14] sm:$0xff] }
 0x695   : > { %v2335_v15 = vpack.c.bf16 %v1582_v38, %v1580_v36  ;;  %v1493_v38 = vld [vmem:[#allocation14 + $0xb8] sm:$0xff] }
 0x696   : > { %v2565_v28 = vpack.i.bf16 %v1065_v27, %v1064_v26  ;;  %2280 = vmatprep.subr.bf16.mxu0 %v2279_v42 }
 0x697   : > { %2282 = vmatpush3.bf16.msra.mxu0 %v2279_v42  ;;  %v1472_v42 = vld [vmem:[#allocation14 + $0x10] sm:$0xff] }
 0x698   : > { %944 = vadd.xlane.f32.xlu1 %v943_v29  ;;  %2284 = vmatprep.subr.bf16.mxu0 %v2283_v33  ;;  %v2305_v43 = vpack.c.bf16 %v1472_v42, %v1470_v39  ;;  %v1600_v39 = vld [vmem:[#allocation16 + $0xa8] sm:$0xff] }
 0x69b   : > { %2286 = vmatpush3.bf16.msra.mxu0 %v2283_v33  ;;  %v1579_v33 = vld [vmem:[#allocation16] sm:$0xff] }
 0x69c   : > { %947 = vadd.xlane.f32.xlu1 %v946_v30  ;;  %2288 = vmatprep.subr.bf16.mxu0 %v2287_v46 }
 0x69f   : > { %2290 = vmatpush3.bf16.msra.mxu0 %v2287_v46  ;;  %v2337_v46 = vpack.c.bf16 %v1581_v44, %v1579_v33  ;;  %v1492_v33 = vld [vmem:[#allocation14 + $0xb0] sm:$0xff] }
 0x6a0   : > { %2292 = vmatprep.subr.bf16.mxu0 %v2291_v50 }
 0x6a3   : > { %2294 = vmatpush3.bf16.msra.mxu0 %v2291_v50  ;;  %v1586_v50 = vld [vmem:[#allocation16 + $0x38] sm:$0xff] }
 0x6a4   : > { %2296 = vmatprep.subr.bf16.mxu0 %v2295_v57 }
 0x6a7   : > { %2298 = vmatpush3.bf16.msra.mxu0 %v2295_v57  ;;  %v1585_v57 = vld [vmem:[#allocation16 + $0x30] sm:$0xff] }
 0x6a8   : > { %2300 = vmatprep.subr.bf16.mxu0 %v2299_v61 }
 0x6ab   : > { %2302 = vmatpush3.bf16.msra.mxu0 %v2299_v61  ;;  %v2341_v61 = vpack.c.bf16 %v1585_v57, %v1583_v55  ;;  %v1494_v55 = vld [vmem:[#allocation14 + $0xc0] sm:$0xff] }
 0x6ac   : > { %2336 = vmatprep.subr.bf16.mxu0 %v2335_v15  ;;  %v1602_v15 = vld [vmem:[#allocation16 + $0xb8] sm:$0xff] }
 0x6ad   : > { %2566 = vrot.lane.b32.xlu1 %v2565_v28, %s3027_s7  ;;  %v2355_v44 = vpack.c.bf16 %v1602_v15, %v1600_v39  ;;  %v1724_v39 = vld [vmem:[#allocation17 + $0x20] sm:$0xff] }
 0x719   : > { %v1204_v51 = vpop.xlane.xlu1 %1203 }
 0x71a   : > { %2604 = vrcp.f32 %v1204_v51  ;;  %v2307_v51 = vpack.c.bf16 %v1477_v48, %v1475_v45  ;;  %v1601_v48 = vld [vmem:[#allocation16 + $0xb0] sm:$0xff] }
 0x71d   : > { %v1201_v52 = vpop.xlane.xlu1 %1200 }
 0x71e   : > { %2606 = vrcp.f32 %v1201_v52  ;;  %v2339_v52 = vpack.c.bf16 %v1586_v50, %v1584_v49  ;;  %v1495_v50 = vld [vmem:[#allocation14 + $0xc8] sm:$0xff] }
 0x71f   : > { %v1210_v53 = vpop.xlane.xlu0 %1209 }
 0x720   : > { %2608 = vrcp.f32 %v1210_v53  ;;  %v1474_v53 = vld [vmem:[#allocation14 + $0x20] sm:$0xff] }
 0x721   : > { %v1207_v54 = vpop.xlane.xlu1 %1206 }
 0x722   : > { %2610 = vrcp.f32 %v1207_v54  ;;  %v1476_v54 = vld [vmem:[#allocation14 + $0x30] sm:$0xff] }
 0x723   : > { %v2309_v56 = vpack.c.bf16 %v1476_v54, %v1474_v53  ;;  %v1606_v54 = vld [vmem:[#allocation16 + $0xd8] sm:$0xff] }
 0x724   : > { %v2605_v62 = vpop.eup %2604 }
 0x725   : > { %v945_v8 = vpop.xlane.xlu1 %944 }
 0x726   : > { %2612 = vrcp.f32 %v945_v8 }
 0x728   : > { %v2607_v63 = vpop.eup %2606 }
 0x729   : > { %v948_v14 = vpop.xlane.xlu1 %947 }
 0x72a   : > { %v2609_v5 = vpop.eup %2608  ;;  %2614 = vrcp.f32 %v948_v14 }
 0x72c   : > { %v2611_v9 = vpop.eup %2610 }
 0x72d   : > { %v2567_v16 = vpop.permute.xlu1 %2566 }
 0x72e   : > { %v2569_v24 = vunpack.i.h.bf16 %v2567_v16  ;;  %v2568_v25 = vunpack.i.l.bf16 %v2567_v16  ;;  %v1483_v16 = vld [vmem:[#allocation14 + $0x68] sm:$0xff] }
 0x730   : > { %v2613_v17 = vpop.eup %2612 }
 0x731   : > { %v1062_v21 = vmul.f32 %v2613_v17, %v3567_v41  ;;  %v1473_v41 = vld [vmem:[#allocation14 + $0x18] sm:$0xff] }
 0x732   : > { %v1485_v17 = vld [vmem:[#allocation14 + $0x78] sm:$0xff] }
 0x733   : > { %v1346_v30 = vsel %vm818_vm1, %v1062_v21, %v2568_v25  ;;  %v1482_v21 = vld [vmem:[#allocation14 + $0x60] sm:$0xff] }
 0x734   : > { %v2615_v18 = vpop.eup %2614 }
 0x735   : > { %v1063_v20 = vmul.f32 %v2615_v18, %v3565_v40  ;;  %v1471_v40 = vld [vmem:[#allocation14 + $0x8] sm:$0xff] }
 0x736   : > { %v2303_v37 = vpack.c.bf16 %v1473_v41, %v1471_v40  ;;  %v1592_v18 = vld [vmem:[#allocation16 + $0x68] sm:$0xff]  ;;  %v1595_v40 = vld [vmem:[#allocation16 + $0x80] sm:$0xff]  ;;  %v1597_v41 = vld [vmem:[#allocation16 + $0x90] sm:$0xff] }
 0x737   : > { %v1347_v27 = vsel %vm818_vm1, %v1063_v20, %v2569_v24  ;;  %v1594_v20 = vld [vmem:[#allocation16 + $0x78] sm:$0xff]  ;;  %v1591_v24 = vld [vmem:[#allocation16 + $0x60] sm:$0xff]  ;;  %v2353_v36 = vpack.c.bf16 %v1597_v41, %v1595_v40  ;;  %v1722_v40 = vld [vmem:[#allocation17 + $0x10] sm:$0xff] }
 0x738   : > { %2304 = vmatprep.subr.bf16.mxu1 %v2303_v37  ;;  %v1491_v37 = vld [vmem:[#allocation14 + $0xa8] sm:$0xff]  ;;  %v1723_v41 = vld [vmem:[#allocation17 + $0x18] sm:$0xff] }
 0x739   : > { %2306 = vmatpush1.bf16.msra.mxu1 %v2305_v43  ;;  %v2323_v42 = vpack.c.bf16 %v1493_v38, %v1491_v37  ;;  %v1490_v43 = vld [vmem:[#allocation14 + $0xa0] sm:$0xff]  ;;  %v1741_v37 = vld [vmem:[#allocation17 + $0xa8] sm:$0xff] }
 0x73a   : > { %2308 = vmatprep.subr.bf16.mxu1 %v2307_v51  ;;  %v2325_v45 = vpack.c.bf16 %v1492_v33, %v1490_v43  ;;  %v1497_v51 = vld [vmem:[#allocation14 + $0xd8] sm:$0xff]  ;;  %v1742_v43 = vld [vmem:[#allocation17 + $0xb0] sm:$0xff] }
 0x73b   : > { %v2327_v53 = vpack.c.bf16 %v1497_v51, %v1495_v50  ;;  %v1743_v33 = vld [vmem:[#allocation17 + $0xb8] sm:$0xff]  ;;  %v1745_v50 = vld [vmem:[#allocation17 + $0xc8] sm:$0xff] }
 0x73d   : > { %2310 = vmatpush1.bf16.msra.mxu1 %v2309_v56  ;;  %v1496_v56 = vld [vmem:[#allocation14 + $0xd0] sm:$0xff] }
 0x760   : > { %v2180_v60 = vpop.f32.mrb[12].mxu1 }
 0x761   : > { %v1319_v2 = vmul.f32 %v2605_v62, %v2180_v60  ;;  %v1295_v3 = vpop.f32.mrb[13].mxu1  ;;  %v2311_v62 = vpack.c.bf16 %v1481_v59, %v1479_v58  ;;  %v1588_v60 = vld [vmem:[#allocation16 + $0x48] sm:$0xff]  ;;  %v2329_v58 = vpack.c.bf16 %v1496_v56, %v1494_v55  ;;  %v1603_v59 = vld [vmem:[#allocation16 + $0xc0] sm:$0xff]  ;;  %v1746_v55 = vld [vmem:[#allocation17 + $0xd0] sm:$0xff] }
 0x762   : > { %v1318_v4 = vmul.f32 %v2607_v63, %v1295_v3  ;;  %v1590_v63 = vld [vmem:[#allocation16 + $0x58] sm:$0xff] }
 0x763   : > { %v2343_v3 = vpack.c.bf16 %v1590_v63, %v1588_v60  ;;  %2312 = vmatprep.subr.bf16.mxu1 %v2311_v62  ;;  %v1499_v60 = vld [vmem:[#allocation14 + $0xe8] sm:$0xff]  ;;  %v1501_v63 = vld [vmem:[#allocation14 + $0xf8] sm:$0xff] }
 0x764   : > { %v2570_v6 = vpack.i.bf16 %v1319_v2, %v1318_v4  ;;  %v2183_v7 = vpop.f32.mrb[14].mxu1  ;;  %v1478_v2 = vld [vmem:[#allocation14 + $0x40] sm:$0xff]  ;;  %v1480_v4 = vld [vmem:[#allocation14 + $0x50] sm:$0xff]  ;;  %v1747_v56 = vld [vmem:[#allocation17 + $0xd8] sm:$0xff] }
 0x765   : > { %v1321_v10 = vmul.f32 %v2609_v5, %v2183_v7  ;;  %v1305_v11 = vpop.f32.mrb[15].mxu1  ;;  %v1587_v5 = vld [vmem:[#allocation16 + $0x40] sm:$0xff]  ;;  %v2313_v7 = vpack.c.bf16 %v1480_v4, %v1478_v2  ;;  %v1608_v2 = vld [vmem:[#allocation16 + $0xe8] sm:$0xff]  ;;  %v1610_v4 = vld [vmem:[#allocation16 + $0xf8] sm:$0xff] }
 0x766   : > { %v1320_v12 = vmul.f32 %v2611_v9, %v1305_v11  ;;  %2571 = vrot.lane.b32.xlu1 %v2570_v6, %s3026_s17  ;;  %v1589_v6 = vld [vmem:[#allocation16 + $0x50] sm:$0xff]  ;;  %s3634_s17 = scalar_lea.hbm %s3743_s23, %s2063_s22 }
 0x767   : > { %v2345_v9 = vpack.c.bf16 %v1589_v6, %v1587_v5  ;;  %2314 = vmatpush1.bf16.msra.mxu1 %v2313_v7  ;;  %v1498_v5 = vld [vmem:[#allocation14 + $0xe0] sm:$0xff]  ;;  %v1500_v6 = vld [vmem:[#allocation14 + $0xf0] sm:$0xff]  ;;  %v2363_v7 = vpack.c.bf16 %v1610_v4, %v1608_v2 }
 0x768   : > { %v2575_v13 = vpack.i.bf16 %v1321_v10, %v1320_v12  ;;  %v1732_v2 = vld [vmem:[#allocation17 + $0x60] sm:$0xff] }
 0x76a   : > { %2576 = vrot.lane.b32.xlu1 %v2575_v13, %s3025_s21  ;;  %s1845_s21 = sshll.u32 %s589_s19, 4  ;;  %s3629_s21 = int_to_ptr.vmem [resolvable:$true] %s1845_s21 }
 0x76b   : > { %s2918_s7 = scalar_lea.vmem %s3629_s21, 256  ;;  %p2925_p6 = scmp.lt.s32.totalorder %s3629_s21, %s2923_s6 }
 0x76c   : > { %p2919_p13 = scmp.ne.s32.totalorder %s3629_s21, %s2918_s7  ;;  %p2926_p10 = scmp.lt.s32.totalorder %s2924_s1, %s2918_s7 }
 0x76e   : > { %p2920_p2 = pnand %p2919_p13, %p3744_p0  ;;  %p2927_p11 = por %p2926_p10, %p2925_p6 }
 0x770   : > { %p2921_p8 = pneg %p2920_p2 }
 0x772   : > { %p2928_p3 = pnand %p2927_p11, %p2921_p8 }
 0x7d8   : > { %v2572_v19 = vpop.permute.xlu1 %2571 }
 0x7d9   : > { %v2574_v22 = vunpack.i.h.bf16 %v2572_v19  ;;  %v2573_v23 = vunpack.i.l.bf16 %v2572_v19  ;;  %v2315_v19 = vpack.c.bf16 %v1485_v17, %v1483_v16 }
 0x7db   : > { %v1350_v31 = vsel %vm1348_vm6, %v1347_v27, %v2574_v22  ;;  %v1349_v32 = vsel %vm1348_vm6, %v1346_v30, %v2573_v23  ;;  %v2347_v22 = vpack.c.bf16 %v1594_v20, %v1592_v18  ;;  %2316 = vmatprep.subr.bf16.mxu1 %v2315_v19  ;;  %v1489_v27 = vld [vmem:[#allocation14 + $0x98] sm:$0xff] }
 0x7dc   : > { %v2577_v26 = vpop.permute.xlu1 %2576  ;;  %v1598_v30 = vld [vmem:[#allocation16 + $0x98] sm:$0xff] }
 0x7dd   : > { %v2579_v28 = vunpack.i.h.bf16 %v2577_v26  ;;  %v2578_v29 = vunpack.i.l.bf16 %v2577_v26  ;;  %v1487_v26 = vld [vmem:[#allocation14 + $0x88] sm:$0xff] }
 0x7df   : > { %v1352_v34 = vsel %vm1351_vm7, %v1349_v32, %v2578_v29  ;;  %v1353_v35 = vsel %vm1351_vm7, %v1350_v31, %v2579_v28  ;;  %v1596_v28 = vld [vmem:[#allocation16 + $0x88] sm:$0xff]  ;;  %v2319_v29 = vpack.c.bf16 %v1489_v27, %v1487_v26  ;;  %v1486_v31 = vld [vmem:[#allocation14 + $0x80] sm:$0xff]  ;;  %v1488_v32 = vld [vmem:[#allocation14 + $0x90] sm:$0xff] }
 0x7e0   : > { %2216 = vmatprep.mubr.f32.mxu0 %v1352_v34  ;;  %v2351_v34 = vpack.c.bf16 %v1598_v30, %v1596_v28  ;;  %v1736_v26 = vld [vmem:[#allocation17 + $0x80] sm:$0xff]  ;;  %v1737_v27 = vld [vmem:[#allocation17 + $0x88] sm:$0xff] }
 0x7e1   : > { %2217 = vmatmul.mubr.f32.vlgmr.msra.gmra.mrb[4].mxu0 %v1353_v35  ;;  %v2321_v35 = vpack.c.bf16 %v1488_v32, %v1486_v31  ;;  %v2367_v28 = vpack.c.bf16 %v1737_v27, %v1736_v26  ;;  %v1721_v30 = vld [vmem:[#allocation17 + $0x8] sm:$0xff]  ;;  %v1738_v32 = vld [vmem:[#allocation17 + $0x90] sm:$0xff] }
 0x7e2   : > { %1675 = vmatprep.mubr.f32.mxu0 %v3020_v47  ;;  %2338 = vmatpush1.bf16.msra.mxu0 %v2337_v46  ;;  %v1599_v46 = vld [vmem:[#allocation16 + $0xa0] sm:$0xff] }
 0x7e3   : > { %2340 = vmatprep.subr.bf16.mxu0 %v2339_v52  ;;  %v2357_v49 = vpack.c.bf16 %v1601_v48, %v1599_v46  ;;  %v1604_v52 = vld [vmem:[#allocation16 + $0xc8] sm:$0xff]  ;;  %v1727_v46 = vld [vmem:[#allocation17 + $0x38] sm:$0xff] }
 0x7e4   : > { %v2359_v57 = vpack.c.bf16 %v1606_v54, %v1604_v52  ;;  %v1728_v52 = vld [vmem:[#allocation17 + $0x40] sm:$0xff] }
 0x7e6   : > { %2342 = vmatpush1.bf16.msra.mxu0 %v2341_v61  ;;  %v1605_v61 = vld [vmem:[#allocation16 + $0xd0] sm:$0xff] }
 0x7e7   : > { %2344 = vmatprep.subr.bf16.mxu0 %v2343_v3  ;;  %v2361_v62 = vpack.c.bf16 %v1605_v61, %v1603_v59  ;;  %v2331_v3 = vpack.c.bf16 %v1501_v63, %v1499_v60  ;;  %v1731_v59 = vld [vmem:[#allocation17 + $0x58] sm:$0xff]  ;;  %v1749_v60 = vld [vmem:[#allocation17 + $0xe8] sm:$0xff] }
 0x7ea   : > { %2346 = vmatpush1.bf16.msra.mxu0 %v2345_v9  ;;  %v2333_v9 = vpack.c.bf16 %v1500_v6, %v1498_v5  ;;  %v1750_v5 = vld [vmem:[#allocation17 + $0xf0] sm:$0xff]  ;;  %v1751_v6 = vld [vmem:[#allocation17 + $0xf8] sm:$0xff] }
 0x7eb   : > { %2348 = vmatprep.subr.bf16.mxu0 %v2347_v22  ;;  %v2052_v22 = vld [vmem:[%s3742_s29] ss:$0 sm:$0xff] }
 0x8b4   : > { %v2218_v10 = vpop.f32.mrb[4].mxu0 }
 0x8b5   : > { %v3609_v11 = vadd.f32 %v2218_v10, %v3466_v1  ;;  %v1436_v12 = vpop.f32.mrb[5].mxu0  ;;  %v1484_v1 = vld [vmem:[#allocation14 + $0x70] sm:$0xff]  ;;  %v1607_v10 = vld [vmem:[#allocation16 + $0xe0] sm:$0xff] }
 0x8b6   : > { %v3612_v13 = vadd.f32 %v1436_v12, %v3464_v0  ;;  %v2317_v23 = vpack.c.bf16 %v1484_v1, %v1482_v21  ;;  %v1593_v0 = vld [vmem:[#allocation16 + $0x70] sm:$0xff] }
 0x8b7   : > { %v1449_v8 = vmul.f32 %v3609_v11, %v3609_v11  ;;  %v2349_v25 = vpack.c.bf16 %v1593_v0, %v1591_v24  ;;  %v1609_v12 = vld [vmem:[#allocation16 + $0xf0] sm:$0xff] }
 0x8b8   : > { %v1448_v14 = vmul.f32 %v3612_v13, %v3612_v13  ;;  %2318 = vmatpush1.bf16.msra.mxu1 %v2317_v23 }
 0x8b9   : > { %1452 = vadd.xlane.f32.xlu1 %v1449_v8  ;;  %2350 = vmatpush1.bf16.msra.mxu0 %v2349_v25  ;;  %v2365_v8 = vpack.c.bf16 %v1609_v12, %v1607_v10  ;;  %v1735_v10 = vld [vmem:[#allocation17 + $0x78] sm:$0xff] }
 0x8ba   : > { %1450 = vadd.xlane.f32.xlu0 %v1448_v14  ;;  %2320 = vmatprep.subr.bf16.mxu1 %v2319_v29  ;;  %v1720_v29 = vld [vmem:[#allocation17] sm:$0xff] }
 0x8bb   : > { %2352 = vmatprep.subr.bf16.mxu0 %v2351_v34  ;;  %v2369_v31 = vpack.c.bf16 %v1721_v30, %v1720_v29  ;;  %v1739_v34 = vld [vmem:[#allocation17 + $0x98] sm:$0xff] }
 0x8bc   : > { %2322 = vmatpush1.bf16.msra.mxu1 %v2321_v35  ;;  %v2371_v35 = vpack.c.bf16 %v1739_v34, %v1738_v32 }
 0x8bd   : > { %2354 = vmatpush1.bf16.msra.mxu0 %v2353_v36  ;;  %2324 = vmatprep.subr.bf16.mxu1 %v2323_v42  ;;  %v2373_v36 = vpack.c.bf16 %v1723_v41, %v1722_v40  ;;  %v1725_v42 = vld [vmem:[#allocation17 + $0x28] sm:$0xff] }
 0x8be   : > { %2356 = vmatprep.subr.bf16.mxu0 %v2355_v44  ;;  %v2377_v15 = vpack.c.bf16 %v1725_v42, %v1724_v39  ;;  %v2379_v44 = vpack.c.bf16 %v1743_v33, %v1742_v43 }
 0x8c0   : > { %2326 = vmatpush1.bf16.msra.mxu1 %v2325_v45  ;;  %v1726_v45 = vld [vmem:[#allocation17 + $0x30] sm:$0xff] }
 0x8c1   : > { %2358 = vmatpush1.bf16.msra.mxu0 %v2357_v49  ;;  %2328 = vmatprep.subr.bf16.mxu1 %v2327_v53  ;;  %v2381_v48 = vpack.c.bf16 %v1727_v46, %v1726_v45  ;;  %v1744_v49 = vld [vmem:[#allocation17 + $0xc0] sm:$0xff]  ;;  %v1729_v53 = vld [vmem:[#allocation17 + $0x48] sm:$0xff] }
 0x8c2   : > { %2360 = vmatprep.subr.bf16.mxu0 %v2359_v57  ;;  %v2383_v51 = vpack.c.bf16 %v1745_v50, %v1744_v49  ;;  %v2385_v54 = vpack.c.bf16 %v1729_v53, %v1728_v52  ;;  %v2387_v57 = vpack.c.bf16 %v1747_v56, %v1746_v55 }
 0x8c4   : > { %2330 = vmatpush1.bf16.msra.mxu1 %v2329_v58  ;;  %v1730_v58 = vld [vmem:[#allocation17 + $0x50] sm:$0xff] }
 0x8c5   : > { %2362 = vmatpush1.bf16.msra.mxu0 %v2361_v62  ;;  %2332 = vmatprep.subr.bf16.mxu1 %v2331_v3  ;;  %v2389_v61 = vpack.c.bf16 %v1731_v59, %v1730_v58  ;;  %v1748_v62 = vld [vmem:[#allocation17 + $0xe0] sm:$0xff]  ;;  %v1733_v3 = vld [vmem:[#allocation17 + $0x68] sm:$0xff] }
 0x8c6   : > { %2364 = vmatprep.subr.bf16.mxu0 %v2363_v7  ;;  %v2391_v63 = vpack.c.bf16 %v1749_v60, %v1748_v62  ;;  %v2393_v4 = vpack.c.bf16 %v1733_v3, %v1732_v2  ;;  %v2395_v7 = vpack.c.bf16 %v1751_v6, %v1750_v5 }
 0x8c8   : > { %2334 = vmatpush1.bf16.msra.mxu1 %v2333_v9  ;;  %v1734_v9 = vld [vmem:[#allocation17 + $0x70] sm:$0xff] }
 0x8c9   : > { %2366 = vmatpush1.bf16.msra.mxu0 %v2365_v8  ;;  %2368 = vmatprep.subr.bf16.mxu1 %v2367_v28  ;;  %v2397_v12 = vpack.c.bf16 %v1735_v10, %v1734_v9 }
 0x946   : > { %v1453_v14 = vpop.xlane.xlu1 %1452 }
 0x947   : > { %v1455_v16 = vmul.f32 0.0078125, %v1453_v14  ;;  %v1451_v17 = vpop.xlane.xlu0 %1450 }
 0x948   : > { %v1454_v18 = vmul.f32 0.0078125, %v1451_v17 }
 0x949   : > { %v1457_v19 = vadd.f32 1e-05, %v1455_v16 }
 0x94a   : > { %v1456_v20 = vadd.f32 1e-05, %v1454_v18 }
 0x94b   : > { %2616 = vrsqrt.f32 %v1457_v19 }
 0x94c   : > { %2618 = vrsqrt.f32 %v1456_v20 }
 0x955   : > { %v2617_v21 = vpop.eup %2616 }
 0x956   : > { %v2619_v1 = vpop.eup %2618  ;;  %v1461_v0 = vmul.f32 %v2617_v21, %v3609_v11 }
 0x957   : > { %v1460_v23 = vmul.f32 %v2619_v1, %v3612_v13 }
 0x958   : > { %v1469_v25 = vmul.f32 %v2052_v22, %v1461_v0 }
 0x959   : > { %v1468_v24 = vmul.f32 %v2052_v22, %v1460_v23 }
 0x95b   : > { %1567 = vmatmul.mubr.f32.vlgmr.msra.gmra.mrb[16].mxu1 %v1468_v24  ;;  %1676 = vmatmul.mubr.f32.vlgmr.msra.gmra.mrb[6].mxu0 %v1468_v24 }
 0x95c   : > { %1572 = vmatprep.mubr.f32.mxu1 %v3020_v47  ;;  %1681 = vmatprep.mubr.f32.mxu0 %v3020_v47  ;;  %v1740_v47 = vld [vmem:[#allocation17 + $0xa0] sm:$0xff] }
 0x95d   : > { %2370 = vmatpush3.bf16.msra.mxu1 %v2369_v31  ;;  %v2375_v38 = vpack.c.bf16 %v1741_v37, %v1740_v47 }
 0x95e   : > { %2372 = vmatprep.subr.bf16.mxu1 %v2371_v35 }
 0x95f   : > { %1573 = vmatmul.mubr.f32.gmra.mrb[18].mxu1 %v1469_v25  ;;  %1682 = vmatmul.mubr.f32.gmra.mrb[8].mxu0 %v1469_v25 }
 0x961   : > { %2374 = vmatpush3.bf16.msra.mxu1 %v2373_v36 }
 0x962   : > { %2376 = vmatprep.subr.bf16.mxu1 %v2375_v38 }
 0x965   : > { %2378 = vmatpush3.bf16.msra.mxu1 %v2377_v15 }
 0x966   : > { %2380 = vmatprep.subr.bf16.mxu1 %v2379_v44 }
 0x969   : > { %2382 = vmatpush3.bf16.msra.mxu1 %v2381_v48 }
 0x96a   : > { %2384 = vmatprep.subr.bf16.mxu1 %v2383_v51 }
 0x96d   : > { %2386 = vmatpush3.bf16.msra.mxu1 %v2385_v54 }
 0x96e   : > { %2388 = vmatprep.subr.bf16.mxu1 %v2387_v57 }
 0x971   : > { %2390 = vmatpush3.bf16.msra.mxu1 %v2389_v61 }
 0x972   : > { %2392 = vmatprep.subr.bf16.mxu1 %v2391_v63 }
 0x975   : > { %2394 = vmatpush3.bf16.msra.mxu1 %v2393_v4 }
 0x976   : > { %2396 = vmatprep.subr.bf16.mxu1 %v2395_v7 }
 0x979   : > { %2398 = vmatpush3.bf16.msra.mxu1 %v2397_v12 }
 0xa2e   : > { %v1568_v8 = vpop.f32.mrb[16].mxu1  ;;  %v1677_v14 = vpop.f32.mrb[6].mxu0 }
 0xa2f   : > { %v2053_v16 = vmul.f32 -1.442695, %v1568_v8  ;;  %v1570_v17 = vpop.f32.mrb[17].mxu1  ;;  %v1679_v18 = vpop.f32.mrb[7].mxu0 }
 0xa30   : > { %v2054_v19 = vmul.f32 -1.442695, %v1570_v17 }
 0xa31   : > { %2620 = vpow2.f32 %v2053_v16 }
 0xa32   : > { %2622 = vpow2.f32 %v2054_v19  ;;  %v1574_v20 = vpop.f32.mrb[18].mxu1  ;;  %v1683_v21 = vpop.f32.mrb[8].mxu0 }
 0xa33   : > { %v2055_v1 = vmul.f32 -1.442695, %v1574_v20  ;;  %v1576_v22 = vpop.f32.mrb[19].mxu1  ;;  %v1685_v23 = vpop.f32.mrb[9].mxu0 }
 0xa34   : > { %v2056_v24 = vmul.f32 -1.442695, %v1576_v22 }
 0xa35   : > { %2624 = vpow2.f32 %v2055_v1 }
 0xa36   : > { %2626 = vpow2.f32 %v2056_v24 }
 0xa3b   : > { %v2621_v0 = vpop.eup %2620 }
 0xa3c   : > { %v2623_v25 = vpop.eup %2622  ;;  %v1700_v26 = vadd.f32 1.0, %v2621_v0 }
 0xa3d   : > { %v1701_v27 = vadd.f32 1.0, %v2623_v25 }
 0xa3e   : > { %2628 = vrcp.f32 %v1700_v26 }
 0xa3f   : > { %v2625_v28 = vpop.eup %2624  ;;  %2630 = vrcp.f32 %v1701_v27 }
 0xa40   : > { %v2627_v29 = vpop.eup %2626  ;;  %v1702_v30 = vadd.f32 1.0, %v2625_v28 }
 0xa41   : > { %v1703_v31 = vadd.f32 1.0, %v2627_v29 }
 0xa42   : > { %2632 = vrcp.f32 %v1702_v30 }
 0xa43   : > { %2634 = vrcp.f32 %v1703_v31 }
 0xa48   : > { %v2629_v32 = vpop.eup %2628 }
 0xa49   : > { %v2631_v34 = vpop.eup %2630  ;;  %v1712_v35 = vmul.f32 %v2629_v32, %v1568_v8 }
 0xa4a   : > { %v1713_v40 = vmul.f32 %v2631_v34, %v1570_v17 }
 0xa4b   : > { %v1716_v41 = vmul.f32 %v1712_v35, %v1677_v14 }
 0xa4c   : > { %v2633_v36 = vpop.eup %2632  ;;  %v1717_v47 = vmul.f32 %v1713_v40, %v1679_v18 }
 0xa4d   : > { %v2635_v37 = vpop.eup %2634  ;;  %v1714_v38 = vmul.f32 %v2633_v36, %v1574_v20 }
 0xa4e   : > { %v1715_v39 = vmul.f32 %v2635_v37, %v1576_v22  ;;  %1816 = vmatprep.mubr.f32.mxu1 %v1717_v47 }
 0xa4f   : > { %v1718_v42 = vmul.f32 %v1714_v38, %v1683_v21  ;;  %1817 = vmatmul.mubr.f32.vlgmr.msra.gmra.mrb[20].mxu1 %v1716_v41 }
 0xa50   : > { %v1719_v15 = vmul.f32 %v1715_v39, %v1685_v23 }
 0xa52   : > { %1821 = vmatprep.mubr.f32.mxu1 %v1719_v15 }
 0xa53   : > { %1822 = vmatmul.mubr.f32.gmra.mrb[22].mxu1 %v1718_v42 }
 0xb22   : > { %v2138_v43 = vpop.f32.mrb[20].mxu1 }
 0xb23   : > { %v2139_v33 = vpop.f32.mrb[21].mxu1 }
 0xb24   : > { %v2140_v44 = vadd.f32 %v2139_v33, %v2138_v43 }
 0xb26   : > { %v1827_v45 = vadd.f32 %v2140_v44, %v3612_v13  ;;  %v2141_v46 = vpop.f32.mrb[22].mxu1 }
 0xb27   : > { %v2142_v48 = vpop.f32.mrb[23].mxu1 }
 0xb28   : > { %1829 = vst [vmem:[%s589_s19] sm:$0xff] %v1827_v45  ;;  %v2143_v49 = vadd.f32 %v2142_v48, %v2141_v46 }
 0xb2a   : > { %v1828_v50 = vadd.f32 %v2143_v49, %v3609_v11 }
 0xb2c   : > { %1830 = vst [vmem:[%s589_s19 + $0x8] sm:$0xff] %v1828_v50 }
 0xb2d   : > { %2931 = shalt.err (!%p2928_p3)
}
 0xb2e   : > { %s2932_s29 = scalar_lea.hbm %s3634_s17, 256  ;;  %s2936_s30 = scalar_lea.hbm %s3743_s23, 512 }
 0xb2f   : > { %p2933_p5 = scmp.ne.s32.totalorder %s3634_s17, %s2932_s29  ;;  %p2937_p4 = scmp.lt.u32.totalorder %s3634_s17, %s3743_s23 }
 0xb30   : > { %p2938_p12 = scmp.lt.u32.totalorder %s2936_s30, %s2932_s29  ;;  %p2940_p13 = scmp.lt.u32.totalorder %s2932_s29, %s3634_s17 }
 0xb31   : > { %p2934_p9 = pnand %p2933_p5, %p3744_p0 }
 0xb32   : > { %p2939_p1 = por %p2938_p12, %p2937_p4 }
 0xb33   : > { %p2935_p7 = pneg %p2934_p9 }
 0xb34   : > { %p2941_p2 = por %p2940_p13, %p2939_p1 }
 0xb36   : > { %p2942_p8 = pnand %p2941_p2, %p2935_p7 }
 0xb38   : > { %2945 = shalt.err (!%p2942_p8)
}
 0xb39   : > { %s3029_s7 = smov 128   ;;  %s3030_s6 = smov 8  }
 0xb3a   : > { %2437 = dma.vmem_to_hbm [thread:$0]  (%p3744_p0), %s3629_s21, 256, %s3634_s17, %s1832_s5, %s3029_s7, %s3029_s7, %s3030_s6  }
 0xb3b PF: > { %s1860_s1 = sand.u32 1, %s2992_s25   ;;  %p3745_p6 = scmp.ne.s32.totalorder %s3722_s24, 0 }
 0xb3c   : > { %p3746_p10 = scmp.ge.s32.totalorder %s3004_s28, 2  ;;  %s1861_s29 = scalar_lea.sflag [#allocation4], %s1860_s1 }
 0xb3e   : > { %p2472_p11 = pnand %p3746_p10, %p3745_p6 }
 0xb40   : > { %2987 = dma.done.wait (!%p2472_p11), %s1861_s29, 256  }
 0xb41   : > { %2989 = vsyncadd (!%p2472_p11), %s1861_s29, 4294967040  ;;  %p31_p3 = scmp.ge.s32.totalorder %s3358_s16, 4   ;;  %s3747_s25 = smov %s2996_s26 }
 0xb42   : > { %s3748_s26 = smov %s3000_s27  ;;  %s3749_s27 = smov %s3370_s3 }
 0xb43   : > { %s3750_s28 = smov %s3358_s16  ;;  %33 = sbr.rel (!%p31_p3) target bundleno = 17 (0x11), region = 153 }
 0xb4a   :  { %1866 = vsyncpa [#allocation3], 1 }
 0xb4b   :  { %1868 = vsyncpa [#allocation3 + $0x1], 1 }
 0xb4c   :  { %1869 = vsyncpa [#allocation6], 1 }
 0xb4d   :  { %1870 = vsyncpa [#allocation9], 1 }
 0xb4e   :  { %1871 = vsyncpa [#allocation12], 1 }
 0xb4f   :  { %1872 = vsyncpa [#allocation15], 1 }
 0xb50   :  { %1873 = vsyncpa [#allocation18], 1 }
 0xb51   :  { %1874 = vsyncpa [#allocation4], 1 }
 0xb52   :  { %1876 = vsyncpa [#allocation4 + $0x1], 1 }

</bundles_post_ra>
